<compile_context>
chip_gen: v7x
topology: tpu7x:2x2x1
jax: 0.10.0
libtpu: 0.0.40
codegen_flags: <defaults>
</compile_context>

<pallas_src>
import jax
import jax.numpy as jnp
from jax.experimental import pallas as pl
from jax.experimental.pallas import tpu as pltpu


def _encoder_block_kernel(x_ref, w1_ref, b1_ref, w2_ref, b2_ref, o_ref, y1_scr):
    """One (batch, H-strip) program: relu(conv2(relu(conv1(x)))), 3x3 VALID.

    x_ref : (1, H, W, Cin)    bf16  full image, resident across the strip axis
    w1_ref: (9*Cin, C1)       bf16  im2col-flattened conv1 weights
    b1_ref: (1, C1)           f32
    w2_ref: (9*C1, C1)        bf16  im2col-flattened conv2 weights
    b2_ref: (1, C1)           f32
    o_ref : (1, th*W_out, C1) f32   output strip, rows flattened as (h, w)
    y1_scr: (th+2, W-2, C1)   bf16  conv1 output strip (VMEM scratch)
    """
    Cin = x_ref.shape[-1]
    H1s, W1, C1 = y1_scr.shape          # strip rows / width after conv1
    th = H1s - 2                        # output rows produced by this program
    W2 = W1 - 2                         # output width (== W - 4)

    s = pl.program_id(1)
    row0 = pl.multiple_of(s * th, th)   # first input row of this strip

    # Input strip with a 4-row halo (2 rows per VALID 3x3 conv).
    xs = x_ref[0, pl.ds(row0, th + 4), :, :]             # (th+4, W, Cin) bf16

    # ---- conv1: im2col (K = 9*Cin) + ONE bf16 MXU matmul, f32 accumulation --
    taps1 = [xs[dh:dh + H1s, dw:dw + W1, :]
             for dh in range(3) for dw in range(3)]      # 9 x (H1s, W1, Cin)
    cols1 = jnp.concatenate(taps1, axis=-1)              # (H1s, W1, 9*Cin)
    y1 = jnp.dot(cols1.reshape(H1s * W1, 9 * Cin), w1_ref[...],
                 preferred_element_type=jnp.float32)     # (H1s*W1, C1) f32
    y1 = jnp.maximum(y1 + b1_ref[0], 0.0)
    y1_scr[...] = y1.reshape(H1s, W1, C1).astype(y1_scr.dtype)

    # ---- conv2: im2col (K = 9*C1) + ONE bf16 MXU matmul, f32 accumulation ---
    y1v = y1_scr[...]                                    # (H1s, W1, C1) bf16
    taps2 = [y1v[dh:dh + th, dw:dw + W2, :]
             for dh in range(3) for dw in range(3)]      # 9 x (th, W2, C1)
    cols2 = jnp.concatenate(taps2, axis=-1)              # (th, W2, 9*C1)
    y2 = jnp.dot(cols2.reshape(th * W2, 9 * C1), w2_ref[...],
                 preferred_element_type=jnp.float32)     # (th*W2, C1) f32
    y2 = jnp.maximum(y2 + b2_ref[0], 0.0)

    # Output rows are already in (h, w)-flattened order -> store directly,
    # no post-matmul reshape.
    o_ref[0] = y2.astype(o_ref.dtype)


def encoder_block_pallas(x_nhwc, w1, b1, w2, b2, *, strip_rows=None):
    """relu(conv2(relu(conv1(x)))) with 3x3 VALID convs.  NHWC in / NHWC out."""
    B, H, W, Cin = x_nhwc.shape
    C1 = w1.shape[-1]
    assert H >= 5 and W >= 5, "need >=5x5 spatial extent for two VALID 3x3 convs"
    H_out, W_out = H - 4, W - 4

    # Output-row strip size: must divide H_out; prefer strips whose flattened
    # (th * W_out) block dim is sublane (8) aligned.
    if strip_rows is None:
        strip_rows = next((t for t in (8, 6, 4, 3, 2, 1)
                           if H_out % t == 0 and (t * W_out) % 8 == 0), H_out)
    th = strip_rows
    n_strips = H_out // th

    # bf16 operands feed the MXU directly; accumulation stays f32 in-kernel.
    xb = x_nhwc.astype(jnp.bfloat16)
    w1f = w1.astype(jnp.bfloat16).reshape(9 * Cin, C1)   # rows = (dh, dw, cin)
    w2f = w2.astype(jnp.bfloat16).reshape(9 * C1, C1)
    b1f = b1.astype(jnp.float32).reshape(1, C1)
    b2f = b2.astype(jnp.float32).reshape(1, C1)

    out_flat = pl.pallas_call(
        _encoder_block_kernel,
        out_shape=jax.ShapeDtypeStruct((B, H_out * W_out, C1), jnp.float32),
        grid_spec=pltpu.PrefetchScalarGridSpec(
            num_scalar_prefetch=0,
            grid=(B, n_strips),
            in_specs=[
                # Full image per batch element; the same block is revisited
                # across the strip axis (no re-fetch per strip).
                # TODO(synk): for very large H*W switch this input to
                # memory_space=pl.ANY + manual halo-strip DMA
                # (pltpu.make_async_copy) to bound input VMEM as well.
                pl.BlockSpec((1, H, W, Cin), lambda b, s: (b, 0, 0, 0)),
                pl.BlockSpec((9 * Cin, C1), lambda b, s: (0, 0)),
                pl.BlockSpec((1, C1), lambda b, s: (0, 0)),
                pl.BlockSpec((9 * C1, C1), lambda b, s: (0, 0)),
                pl.BlockSpec((1, C1), lambda b, s: (0, 0)),
            ],
            out_specs=pl.BlockSpec((1, th * W_out, C1), lambda b, s: (b, s, 0)),
            scratch_shapes=[pltpu.VMEM((th + 2, W - 2, C1), jnp.bfloat16)],
        ),
        compiler_params=pltpu.CompilerParams(
            dimension_semantics=("parallel", "parallel"),
            vmem_limit_bytes=32 * 1024 * 1024,
        ),
    )(xb, w1f, b1f, w2f, b2f)

    return out_flat.reshape(B, H_out, W_out, C1)


class EncoderPallas:
    """JAX/Pallas equivalent of the (effective) PyTorch Encoder forward."""

    def __init__(self, channels=(3, 64, 128, 256, 512, 1024),
                 key=jax.random.PRNGKey(0)):
        # Only the last Block(channels[-2], channels[-1]) survives (name clash).
        cin, cout = channels[-2], channels[-1]
        self.cin, self.cout = cin, cout
        k1, k2, k3, k4 = jax.random.split(key, 4)
        bound1 = 1.0 / float(cin * 9) ** 0.5     # PyTorch-style fan-in bounds
        bound2 = 1.0 / float(cout * 9) ** 0.5
        self.w1 = jax.random.uniform(k1, (3, 3, cin, cout), jnp.float32,
                                     -bound1, bound1)   # HWIO
        self.b1 = jax.random.uniform(k2, (cout,), jnp.float32, -bound1, bound1)
        self.w2 = jax.random.uniform(k3, (3, 3, cout, cout), jnp.float32,
                                     -bound2, bound2)
        self.b2 = jax.random.uniform(k4, (cout,), jnp.float32, -bound2, bound2)

    def __call__(self, x_nchw):
        x_nhwc = jnp.transpose(x_nchw, (0, 2, 3, 1))
        y_nhwc = encoder_block_pallas(x_nhwc, self.w1, self.b1, self.w2, self.b2)
        y_nchw = jnp.transpose(y_nhwc, (0, 3, 1, 2))
        # TODO(synk): `self.maxpool1(output)` in the original forward would
        # raise AttributeError and its result is discarded anyway - skipped.
        return [y_nchw]   # forward returns `filters` with a single entry


def _reference_nchw(x, enc):
    """Plain-JAX reference of the same math (mirrors the bf16 operand cast)."""
    f32, bf = jnp.float32, jnp.bfloat16
    xb = x.astype(bf).astype(f32)
    w1 = jnp.transpose(enc.w1.astype(bf).astype(f32), (3, 2, 0, 1))  # HWIO->OIHW
    w2 = jnp.transpose(enc.w2.astype(bf).astype(f32), (3, 2, 0, 1))
    y = jax.lax.conv_general_dilated(xb, w1, (1, 1), 'VALID',
                                     precision=jax.lax.Precision.HIGHEST)
    y = jax.nn.relu(y + enc.b1[None, :, None, None])
    y = y.astype(bf).astype(f32)          # mirror the bf16 y1 scratch
    y = jax.lax.conv_general_dilated(y, w2, (1, 1), 'VALID',
                                     precision=jax.lax.Precision.HIGHEST)
    y = jax.nn.relu(y + enc.b2[None, :, None, None])
    return y


if __name__ == "__main__":
    key = jax.random.PRNGKey(0)
    kx, kp = jax.random.split(key)

    # Small channel tuple (constructor-consistent); retained block is Block(16, 32).
    channels = (4, 8, 16, 32)
    enc = EncoderPallas(channels=channels, key=kp)

    B, H, W = 2, 16, 16
    x = jax.random.normal(kx, (B, enc.cin, H, W), jnp.float32)  # NCHW like PyTorch

    filters = enc(x)
    out = jax.block_until_ready(filters[0])

    ref = _reference_nchw(x, enc)
    assert out.shape == (B, enc.cout, H - 4, W - 4), out.shape
    assert jnp.allclose(out, ref, atol=2e-2, rtol=2e-2), \
        float(jnp.max(jnp.abs(out - ref)))

    print("KERNEL_OK")
</pallas_src>

<mosaic_0001>
module attributes {stable_mosaic.version = 11 : i64} {
  func.func @_encoder_block_kernel(%arg0: i32, %arg1: i32, %arg2: memref<1x16x16x16xbf16, #tpu.memory_space<vmem>>, %arg3: memref<144x32xbf16, #tpu.memory_space<vmem>>, %arg4: memref<1x32xf32, #tpu.memory_space<vmem>>, %arg5: memref<288x32xbf16, #tpu.memory_space<vmem>>, %arg6: memref<1x32xf32, #tpu.memory_space<vmem>>, %arg7: memref<1x72x32xf32, #tpu.memory_space<vmem>>, %arg8: memref<8x14x32xbf16, #tpu.memory_space<vmem>>) attributes {dimension_semantics = [#tpu.dimension_semantics<parallel>, #tpu.dimension_semantics<parallel>], iteration_bounds = array<i64: 2, 2>, scalar_prefetch = 0 : i64, scratch_operands = 1 : i64, tpu.core_type = #tpu.core_type<tc>, window_params = [{transform_indices = @transform_0, window_bounds = array<i64: 1, 16, 16, 16>}, {pipeline_mode = #tpu.pipeline_mode<synchronous>, transform_indices = @transform_1, window_bounds = array<i64: 144, 32>}, {pipeline_mode = #tpu.pipeline_mode<synchronous>, transform_indices = @transform_2, window_bounds = array<i64: 1, 32>}, {pipeline_mode = #tpu.pipeline_mode<synchronous>, transform_indices = @transform_3, window_bounds = array<i64: 288, 32>}, {pipeline_mode = #tpu.pipeline_mode<synchronous>, transform_indices = @transform_4, window_bounds = array<i64: 1, 32>}, {transform_indices = @transform_5, window_bounds = array<i64: 1, 72, 32>}]} {
    %c6_i32 = arith.constant 6 : i32
    %0 = arith.muli %arg1, %c6_i32 : i32
    %1 = tpu.assume_multiple %0, 6 : i32
    %c0 = arith.constant 0 : index
    %2 = arith.index_cast %1 : i32 to index
    %c0_0 = arith.constant 0 : index
    %c0_1 = arith.constant 0 : index
    %3 = vector.load %arg2[%c0, %2, %c0_0, %c0_1] : memref<1x16x16x16xbf16, #tpu.memory_space<vmem>>, vector<1x10x16x16xbf16>
    %4 = vector.shape_cast %3 : vector<1x10x16x16xbf16> to vector<10x16x16xbf16>
    %5 = vector.extract_strided_slice %4 {offsets = [0, 0, 0], sizes = [8, 14, 16], strides = [1, 1, 1]} : vector<10x16x16xbf16> to vector<8x14x16xbf16>
    %6 = vector.extract_strided_slice %4 {offsets = [0, 1, 0], sizes = [8, 14, 16], strides = [1, 1, 1]} : vector<10x16x16xbf16> to vector<8x14x16xbf16>
    %7 = vector.extract_strided_slice %4 {offsets = [0, 2, 0], sizes = [8, 14, 16], strides = [1, 1, 1]} : vector<10x16x16xbf16> to vector<8x14x16xbf16>
    %8 = vector.extract_strided_slice %4 {offsets = [1, 0, 0], sizes = [8, 14, 16], strides = [1, 1, 1]} : vector<10x16x16xbf16> to vector<8x14x16xbf16>
    %9 = vector.extract_strided_slice %4 {offsets = [1, 1, 0], sizes = [8, 14, 16], strides = [1, 1, 1]} : vector<10x16x16xbf16> to vector<8x14x16xbf16>
    %10 = vector.extract_strided_slice %4 {offsets = [1, 2, 0], sizes = [8, 14, 16], strides = [1, 1, 1]} : vector<10x16x16xbf16> to vector<8x14x16xbf16>
    %11 = vector.extract_strided_slice %4 {offsets = [2, 0, 0], sizes = [8, 14, 16], strides = [1, 1, 1]} : vector<10x16x16xbf16> to vector<8x14x16xbf16>
    %12 = vector.extract_strided_slice %4 {offsets = [2, 1, 0], sizes = [8, 14, 16], strides = [1, 1, 1]} : vector<10x16x16xbf16> to vector<8x14x16xbf16>
    %13 = vector.extract_strided_slice %4 {offsets = [2, 2, 0], sizes = [8, 14, 16], strides = [1, 1, 1]} : vector<10x16x16xbf16> to vector<8x14x16xbf16>
    %14 = tpu.concatenate %5, %6, %7, %8, %9, %10, %11, %12, %13 in 2 : vector<8x14x16xbf16>, vector<8x14x16xbf16>, vector<8x14x16xbf16>, vector<8x14x16xbf16>, vector<8x14x16xbf16>, vector<8x14x16xbf16>, vector<8x14x16xbf16>, vector<8x14x16xbf16>, vector<8x14x16xbf16> -> vector<8x14x144xbf16>
    %15 = vector.shape_cast %14 : vector<8x14x144xbf16> to vector<112x144xbf16>
    %c0_2 = arith.constant 0 : index
    %c0_3 = arith.constant 0 : index
    %16 = vector.load %arg3[%c0_2, %c0_3] : memref<144x32xbf16, #tpu.memory_space<vmem>>, vector<144x32xbf16>
    %cst = arith.constant dense<0.000000e+00> : vector<112x32xf32>
    %17 = tpu.matmul %15, %16, %cst {dimension_numbers = #tpu.dot_dimension_numbers<[1], [0], [0], [1], [0, 0, 1, 1], [], []>} : vector<112x144xbf16>, vector<144x32xbf16>, vector<112x32xf32> -> vector<112x32xf32>
    %c0_4 = arith.constant 0 : index
    %c0_5 = arith.constant 0 : index
    %18 = vector.load %arg4[%c0_4, %c0_5] : memref<1x32xf32, #tpu.memory_space<vmem>>, vector<1x32xf32>
    %19 = vector.shape_cast %18 : vector<1x32xf32> to vector<32xf32>
    %20 = vector.shape_cast %19 : vector<32xf32> to vector<1x32xf32>
    %21 = vector.broadcast %20 : vector<1x32xf32> to vector<112x32xf32>
    %22 = arith.addf %17, %21 : vector<112x32xf32>
    %cst_6 = arith.constant 0.000000e+00 : f32
    %23 = vector.broadcast %cst_6 : f32 to vector<112x32xf32>
    %24 = arith.maximumf %22, %23 : vector<112x32xf32>
    %25 = vector.shape_cast %24 : vector<112x32xf32> to vector<8x14x32xf32>
    %26 = arith.truncf %25 : vector<8x14x32xf32> to vector<8x14x32xbf16>
    %c0_7 = arith.constant 0 : index
    %c0_8 = arith.constant 0 : index
    %c0_9 = arith.constant 0 : index
    %27 = vector.load %arg8[%c0_7, %c0_8, %c0_9] : memref<8x14x32xbf16, #tpu.memory_space<vmem>>, vector<8x14x32xbf16>
    tpu.vector_store %arg8[%c0_7, %c0_8, %c0_9], %26 {strides = array<i32>} : memref<8x14x32xbf16, #tpu.memory_space<vmem>>, vector<8x14x32xbf16>,
    %c0_10 = arith.constant 0 : index
    %c0_11 = arith.constant 0 : index
    %c0_12 = arith.constant 0 : index
    %28 = vector.load %arg8[%c0_10, %c0_11, %c0_12] : memref<8x14x32xbf16, #tpu.memory_space<vmem>>, vector<8x14x32xbf16>
    %29 = vector.extract_strided_slice %28 {offsets = [0, 0, 0], sizes = [6, 12, 32], strides = [1, 1, 1]} : vector<8x14x32xbf16> to vector<6x12x32xbf16>
    %30 = vector.extract_strided_slice %28 {offsets = [0, 1, 0], sizes = [6, 12, 32], strides = [1, 1, 1]} : vector<8x14x32xbf16> to vector<6x12x32xbf16>
    %31 = vector.extract_strided_slice %28 {offsets = [0, 2, 0], sizes = [6, 12, 32], strides = [1, 1, 1]} : vector<8x14x32xbf16> to vector<6x12x32xbf16>
    %32 = vector.extract_strided_slice %28 {offsets = [1, 0, 0], sizes = [6, 12, 32], strides = [1, 1, 1]} : vector<8x14x32xbf16> to vector<6x12x32xbf16>
    %33 = vector.extract_strided_slice %28 {offsets = [1, 1, 0], sizes = [6, 12, 32], strides = [1, 1, 1]} : vector<8x14x32xbf16> to vector<6x12x32xbf16>
    %34 = vector.extract_strided_slice %28 {offsets = [1, 2, 0], sizes = [6, 12, 32], strides = [1, 1, 1]} : vector<8x14x32xbf16> to vector<6x12x32xbf16>
    %35 = vector.extract_strided_slice %28 {offsets = [2, 0, 0], sizes = [6, 12, 32], strides = [1, 1, 1]} : vector<8x14x32xbf16> to vector<6x12x32xbf16>
    %36 = vector.extract_strided_slice %28 {offsets = [2, 1, 0], sizes = [6, 12, 32], strides = [1, 1, 1]} : vector<8x14x32xbf16> to vector<6x12x32xbf16>
    %37 = vector.extract_strided_slice %28 {offsets = [2, 2, 0], sizes = [6, 12, 32], strides = [1, 1, 1]} : vector<8x14x32xbf16> to vector<6x12x32xbf16>
    %38 = tpu.concatenate %29, %30, %31, %32, %33, %34, %35, %36, %37 in 2 : vector<6x12x32xbf16>, vector<6x12x32xbf16>, vector<6x12x32xbf16>, vector<6x12x32xbf16>, vector<6x12x32xbf16>, vector<6x12x32xbf16>, vector<6x12x32xbf16>, vector<6x12x32xbf16>, vector<6x12x32xbf16> -> vector<6x12x288xbf16>
    %39 = vector.shape_cast %38 : vector<6x12x288xbf16> to vector<72x288xbf16>
    %c0_13 = arith.constant 0 : index
    %c0_14 = arith.constant 0 : index
    %40 = vector.load %arg5[%c0_13, %c0_14] : memref<288x32xbf16, #tpu.memory_space<vmem>>, vector<288x32xbf16>
    %cst_15 = arith.constant dense<0.000000e+00> : vector<72x32xf32>
    %41 = tpu.matmul %39, %40, %cst_15 {dimension_numbers = #tpu.dot_dimension_numbers<[1], [0], [0], [1], [0, 0, 1, 1], [], []>} : vector<72x288xbf16>, vector<288x32xbf16>, vector<72x32xf32> -> vector<72x32xf32>
    %c0_16 = arith.constant 0 : index
    %c0_17 = arith.constant 0 : index
    %42 = vector.load %arg6[%c0_16, %c0_17] : memref<1x32xf32, #tpu.memory_space<vmem>>, vector<1x32xf32>
    %43 = vector.shape_cast %42 : vector<1x32xf32> to vector<32xf32>
    %44 = vector.shape_cast %43 : vector<32xf32> to vector<1x32xf32>
    %45 = vector.broadcast %44 : vector<1x32xf32> to vector<72x32xf32>
    %46 = arith.addf %41, %45 : vector<72x32xf32>
    %cst_18 = arith.constant 0.000000e+00 : f32
    %47 = vector.broadcast %cst_18 : f32 to vector<72x32xf32>
    %48 = arith.maximumf %46, %47 : vector<72x32xf32>
    %c0_19 = arith.constant 0 : index
    %c0_20 = arith.constant 0 : index
    %c0_21 = arith.constant 0 : index
    %49 = vector.load %arg7[%c0_19, %c0_20, %c0_21] : memref<1x72x32xf32, #tpu.memory_space<vmem>>, vector<1x72x32xf32>
    %50 = vector.shape_cast %49 : vector<1x72x32xf32> to vector<72x32xf32>
    %51 = vector.shape_cast %48 : vector<72x32xf32> to vector<1x72x32xf32>
    tpu.vector_store %arg7[%c0_19, %c0_20, %c0_21], %51 {strides = array<i32>} : memref<1x72x32xf32, #tpu.memory_space<vmem>>, vector<1x72x32xf32>,
    return
  }
  func.func @transform_0(%arg0: i32, %arg1: i32) -> (i32, i32, i32, i32) {
    %c0_i32 = arith.constant 0 : i32
    %c0_i32_0 = arith.constant 0 : i32
    %c0_i32_1 = arith.constant 0 : i32
    %c0_i32_2 = arith.constant 0 : i32
    return %arg0, %c0_i32, %c0_i32_0, %c0_i32_1 : i32, i32, i32, i32
  }
  func.func @transform_1(%arg0: i32, %arg1: i32) -> (i32, i32) {
    %c0_i32 = arith.constant 0 : i32
    %c0_i32_0 = arith.constant 0 : i32
    %c0_i32_1 = arith.constant 0 : i32
    return %c0_i32, %c0_i32_0 : i32, i32
  }
  func.func @transform_2(%arg0: i32, %arg1: i32) -> (i32, i32) {
    %c0_i32 = arith.constant 0 : i32
    %c0_i32_0 = arith.constant 0 : i32
    %c0_i32_1 = arith.constant 0 : i32
    return %c0_i32, %c0_i32_0 : i32, i32
  }
  func.func @transform_3(%arg0: i32, %arg1: i32) -> (i32, i32) {
    %c0_i32 = arith.constant 0 : i32
    %c0_i32_0 = arith.constant 0 : i32
    %c0_i32_1 = arith.constant 0 : i32
    return %c0_i32, %c0_i32_0 : i32, i32
  }
  func.func @transform_4(%arg0: i32, %arg1: i32) -> (i32, i32) {
    %c0_i32 = arith.constant 0 : i32
    %c0_i32_0 = arith.constant 0 : i32
    %c0_i32_1 = arith.constant 0 : i32
    return %c0_i32, %c0_i32_0 : i32, i32
  }
  func.func @transform_5(%arg0: i32, %arg1: i32) -> (i32, i32, i32) {
    %c0_i32 = arith.constant 0 : i32
    %c0_i32_0 = arith.constant 0 : i32
    return %arg0, %arg1, %c0_i32 : i32, i32, i32
  }
}

</mosaic_0001>

<bundles_post_ra>
// kernel: tpu_custom_call.1
= control target key start
LH: loop header
LB: loop body
LE: loop exit
PB: predicated region body
PF: predicated region fallthrough
CT: control target
= control target key end

     0   :  { %s3781_s18 = smov 0   ;;  %s3783_s19 = smov 0   ;;  %s4692_s0 = inlined_call_operand.vmem [shape: bf16[2,16,16,16], index: 0, kind: input, shape index: {}]   ;;  %s4693_s1 = inlined_call_operand.vmem [shape: bf16[144,32], index: 1, kind: input, shape index: {}]   ;;  %s4694_s2 = inlined_call_operand.vmem [shape: f32[1,32], index: 2, kind: input, shape index: {}]   ;;  %s4695_s3 = inlined_call_operand.vmem [shape: bf16[288,32], index: 3, kind: input, shape index: {}]   ;;  %s4696_s4 = inlined_call_operand.vmem [shape: f32[1,32], index: 4, kind: input, shape index: {}]   ;;  %s4697_s5 = inlined_call_operand.vmem [shape: f32[2,144,32], index: 5, kind: output, shape index: {}]  }
   0x1   :  { %s3785_s20 = smov 0   ;;  %s3787_s21 = smov 0  }
   0x2   :  { %s3789_s22 = smov 0  }
   0x3 LB: > { %s24_s23 = sadd.s32 1, %s3729_s20  ;;  %s27_s24 = sadd.s32 1, %s3733_s21  ;;  %s3737_s22 = sphi %s3789_s22, %s15_s22   ;;  %s3733_s21 = sphi %s3787_s21, %s4701_s21   ;;  %s3729_s20 = sphi %s3785_s20, %s4700_s20   ;;  %s3725_s19 = sphi %s3783_s19, %s4699_s19   ;;  %s3721_s18 = sphi %s3781_s18, %s4698_s18  }
   0x4   : > { %p25_p0 = scmp.ge.s32.totalorder %s24_s23, 2  ;;  %p3391_p1 = scmp.ge.s32.totalorder %s3737_s22, 1 }
   0x5   : > { %p201_p2 = scmp.lt.s32.totalorder %s3737_s22, 5 }
   0x6   : > { %s4703_s23 = smov (%p25_p0, %s24_s23), 0  ;;  %s4705_s24 = smov (!%p25_p0, %s27_s24), %s3733_s21 }
   0x7   : > { %p202_p3 = pnand %p3391_p1, %p201_p2  ;;  %p29_p4 = scmp.ge.s32.totalorder %s4705_s24, 2 }
   0x8   : > { %p233_p5 = scmp.lt.s32.totalorder (!%p202_p3), %s3725_s19, 1  ;;  %s3491_s25 = smul.u32 (!%p202_p3), 48, %s3721_s18  ;;  %v3664_v0 = vld [vmem:[%s4693_s1] sm:$0xff] (!%p202_p3)   ;;  %v3739_v1 = vmov (!%p202_p3), 0   ;;  %v3665_v19 = vld [vmem:[%s4693_s1 + $0x8] sm:$0xff] (!%p202_p3)   ;;  %v3666_v22 = vld [vmem:[%s4693_s1 + $0x10] sm:$0xff] (!%p202_p3)  }
   0x9   : > { %s4707_s24 = smov (%p29_p4, %s4705_s24), 0  ;;  %205 = sbr.rel (%p202_p3) target bundleno = 908 (0x38c), region = 40 }
   0xa   : > { %1603 = vmatprep.subr.bf16.mxu0 (!%p202_p3), %v3739_v1  ;;  %s3740_s8 = smov (!%p202_p3), 48   ;;  %s3741_s9 = smov (!%p202_p3), 32   ;;  %v3667_v26 = vld [vmem:[%s4693_s1 + $0x18] sm:$0xff] (!%p202_p3)   ;;  %v3668_v28 = vld [vmem:[%s4693_s1 + $0x20] sm:$0xff] (!%p202_p3)   ;;  %v3669_v31 = vld [vmem:[%s4693_s1 + $0x28] sm:$0xff] (!%p202_p3)   ;;  %vm515_vm0 = vcmask (!%p202_p3), 130048  }
   0xb   : > { %1604 = vmatpush1.bf16.msra.mxu0 (!%p202_p3), %v3664_v0  ;;  %s3742_s10 = smov (!%p202_p3), 96   ;;  %s3743_s11 = smov (!%p202_p3), 80   ;;  %v3670_v32 = vld [vmem:[%s4693_s1 + $0x30] sm:$0xff] (!%p202_p3)   ;;  %v3671_v36 = vld [vmem:[%s4693_s1 + $0x38] sm:$0xff] (!%p202_p3)   ;;  %v3672_v39 = vld [vmem:[%s4693_s1 + $0x40] sm:$0xff] (!%p202_p3)   ;;  %vm532_vm1 = vcmask (!%p202_p3), 261120  }
   0xc   : > { %1605 = vmatprep.subr.bf16.mxu0 (!%p202_p3), %v3739_v1  ;;  %s3744_s14 = smov (!%p202_p3), 16   ;;  %s3745_s17 = smov (!%p202_p3), 64   ;;  %vm549_vm2 = vcmask (!%p202_p3), 392192   ;;  %vm566_vm3 = vcmask (!%p202_p3), 523264   ;;  %vm583_vm4 = vcmask (!%p202_p3), 654336   ;;  %vm600_vm5 = vcmask (!%p202_p3), 785408  }
   0xd   : > { %s3746_s27 = smov (!%p202_p3), 112   ;;  %vm617_vm6 = vcmask (!%p202_p3), 916480   ;;  %vm2302_vm7 = vcmask (!%p202_p3), 257024   ;;  %vm2304_vm8 = vcmask (!%p202_p3), 256000   ;;  %vm3750_vm9 = vmmov (!%p202_p3), 0   ;;  %s238_s28 = smul.u32 (!%p202_p3), 9, %s3721_s18 }
   0xf   : > { %1606 = vmatpush1.bf16.msra.mxu0 (!%p202_p3), %v3665_v19  ;;  %p241_p6 = scmp.lt.s32.totalorder (!%p202_p3), %s238_s28, 17 }
  0x10   : > { %s4709_s19 = smov (!%p233_p5, %s3725_s19), 1  ;;  %1607 = vmatprep.subr.bf16.mxu0 %v3739_v1 }
  0x11   : > { %s3490_s26 = sshll.u32 %s4709_s19, 7  ;;  %s3601_s29 = smul.u32 18, %s4709_s19 }
  0x12   : > { %s237_s6 = scalar_lea.vmem %s4692_s0, %s3490_s26  ;;  %s4711_s28 = smov (!%p241_p6, %s238_s28), 17 }
  0x13   : > { %s3824_s7 = scalar_lea.vmem %s237_s6, %s3491_s25  ;;  %1608 = vmatpush1.bf16.msra.mxu0 %v3666_v22  ;;  %s244_s30 = sadd.s32 %s3601_s29, %s4711_s28 }
  0x14   : > { %v3827_v2 = vld [vmem:[%s3824_s7 + $0x10] sm:$0xff]   ;;  %v3831_v3 = vld [vmem:[%s3824_s7 + $0x8] sm:$0xff]   ;;  %v3836_v4 = vld [vmem:[%s3824_s7] sm:$0xff]   ;;  %1609 = vmatprep.subr.bf16.mxu0 %v3739_v1  ;;  %s3394_s12 = sshll.u32 %s244_s30, 3 }
  0x15   : > { %416 = vrot.lane.b32.xlu0 %v3827_v2, %s3740_s8  ;;  %414 = vrot.lane.b32.xlu1 %v3831_v3, %s3740_s8  ;;  %v323_v5 = vshll.u32 %v3831_v3, 16  ;;  %v385_v6 = vrot.slane %v3836_v4, 1  ;;  %v316_v7 = vshll.u32 %v3836_v4, 16  ;;  %v386_v8 = vrot.slane %v3831_v3, 1  ;;  %v3854_v18 = vld [vmem:[%s3824_s7 + $0x18] sm:$0xff]   ;;  %v3877_v27 = vld [vmem:[%s3824_s7 + $0x20] sm:$0xff]   ;;  %s4657_s15 = scalar_lea.vmem %s4697_s5, %s3394_s12 }
  0x16   : > { %v330_v9 = vshll.u32 %v3827_v2, 16  ;;  %v314_v10 = vshrl.u32 %v3836_v4, 16  ;;  %v321_v12 = vshrl.u32 %v3831_v3, 16  ;;  %v328_v15 = vshrl.u32 %v3827_v2, 16  ;;  %v3917_v38 = vld [vmem:[%s3824_s7 + $0x28] sm:$0xff]   ;;  %v3941_v45 = vld [vmem:[%s3824_s7 + $0x30] sm:$0xff]  }
  0x17   : > { %v318_v11 = vrot.slane %v316_v7, 1  ;;  %v325_v13 = vrot.slane %v323_v5, 1  ;;  %v337_v21 = vshll.u32 %v3854_v18, 16  ;;  %v3868_v23 = vrot.slane %v3827_v2, 1  ;;  %1610 = vmatpush1.bf16.msra.mxu0 %v3667_v26  ;;  %v3959_v51 = vld [vmem:[%s3824_s7 + $0x38] sm:$0xff]   ;;  %v3662_v57 = vld [vmem:[%s3824_s7 + $0x40] sm:$0xff]  }
  0x18   : > { %v332_v16 = vrot.slane %v330_v9, 1  ;;  %v335_v24 = vshrl.u32 %v3854_v18, 16  ;;  %1611 = vmatprep.subr.bf16.mxu0 %v3739_v1  ;;  %v344_v30 = vshll.u32 %v3877_v27, 16  ;;  %v3904_v33 = vrot.slane %v3854_v18, 1  ;;  %v3992_v63 = vld [vmem:[%s3824_s7 + $0x48] sm:$0xff]  }
  0x19   : > { %393 = vrot.lane.b32.xlu0 %v385_v6, %s3741_s9  ;;  %475 = vrot.lane.b32.xlu1 %v3827_v2, %s3742_s10  ;;  %v319_v14 = vor.u32 %v318_v11, %v314_v10  ;;  %v326_v17 = vor.u32 %v325_v13, %v321_v12  ;;  %v339_v25 = vrot.slane %v337_v21, 1  ;;  %v342_v34 = vshrl.u32 %v3877_v27, 16 }
  0x1a   : > { %v333_v20 = vor.u32 %v332_v16, %v328_v15  ;;  %v346_v35 = vrot.slane %v344_v30, 1  ;;  %v351_v40 = vshll.u32 %v3917_v38, 16  ;;  %v3931_v41 = vrot.slane %v3877_v27, 1 }
  0x1b   : > { %v340_v29 = vor.u32 %v339_v25, %v335_v24  ;;  %1612 = vmatpush1.bf16.msra.mxu0 %v3668_v28  ;;  %v349_v42 = vshrl.u32 %v3917_v38, 16  ;;  %v358_v46 = vshll.u32 %v3941_v45, 16  ;;  %v3950_v47 = vrot.slane %v3917_v38, 1 }
  0x1c   : > { %1613 = vmatprep.subr.bf16.mxu0 %v3739_v1  ;;  %v347_v37 = vor.u32 %v346_v35, %v342_v34  ;;  %v353_v43 = vrot.slane %v351_v40, 1  ;;  %v356_v48 = vshrl.u32 %v3941_v45, 16  ;;  %v365_v52 = vshll.u32 %v3959_v51, 16 }
  0x1d   : > { %395 = vrot.lane.b32.xlu0 %v386_v8, %s3741_s9  ;;  %454 = vrot.lane.b32.xlu1 %v386_v8, %s3743_s11  ;;  %v360_v49 = vrot.slane %v358_v46, 1  ;;  %v3969_v53 = vrot.slane %v3941_v45, 1  ;;  %v363_v54 = vshrl.u32 %v3959_v51, 16  ;;  %v433_v58 = vshll.u32 %v3662_v57, 16 }
  0x1e   : > { %v354_v44 = vor.u32 %v353_v43, %v349_v42  ;;  %v367_v55 = vrot.slane %v365_v52, 1  ;;  %v3985_v59 = vrot.slane %v3959_v51, 1  ;;  %v431_v60 = vshrl.u32 %v3662_v57, 16 }
  0x1f   : > { %1614 = vmatpush1.bf16.msra.mxu0 %v3669_v31  ;;  %v361_v50 = vor.u32 %v360_v49, %v356_v48  ;;  %v435_v61 = vrot.slane %v433_v58, 1  ;;  %v494_v0 = vshll.u32 %v3992_v63, 16  ;;  %v492_v5 = vshrl.u32 %v3992_v63, 16 }
  0x20   : > { %1615 = vmatprep.subr.bf16.mxu0 %v3739_v1  ;;  %v368_v56 = vor.u32 %v367_v55, %v363_v54 }
  0x21   : > { %369 = vrot.lane.b32.xlu0 %v319_v14, %s3744_s14  ;;  %371 = vrot.lane.b32.xlu1 %v326_v17, %s3744_s14  ;;  %v436_v62 = vor.u32 %v435_v61, %v431_v60  ;;  %v496_v6 = vrot.slane %v494_v0, 1 }
  0x23   : > { %1616 = vmatpush1.bf16.msra.mxu0 %v3670_v32  ;;  %v497_v7 = vor.u32 %v496_v6, %v492_v5 }
  0x24   : > { %1617 = vmatprep.subr.bf16.mxu0 %v3739_v1 }
  0x25   : > { %439 = vrot.lane.b32.xlu0 %v333_v20, %s3745_s17  ;;  %437 = vrot.lane.b32.xlu1 %v326_v17, %s3745_s17  ;;  %v3747_v17 = vmov 1966171168  }
  0x26   : > { %v645_v19 = vunpack.c.l.s4 %v3747_v17 }
  0x27   : > { %1618 = vmatpush1.bf16.msra.mxu0 %v3671_v36 }
  0x28   : > { %1619 = vmatprep.subr.bf16.mxu0 %v3739_v1  ;;  %v4000_v1 = vrot.slane %v3662_v57, 1  ;;  %v646_v28 = vunpack.c.0.s8 %v645_v19 }
  0x29   : > { %456 = vrot.lane.b32.xlu0 %v3868_v23, %s3743_s11  ;;  %498 = vrot.lane.b32.xlu1 %v333_v20, %s3746_s27 }
  0x2b   : > { %1620 = vmatpush1.bf16.msra.mxu0 %v3672_v39 }
  0x2d   : > { %477 = vrot.lane.b32.xlu0 %v3854_v18, %s3742_s10  ;;  %373 = vrot.lane.b32.xlu1 %v333_v20, %s3744_s14  ;;  %v647_v20 = vlaneseq }
  0x31   : > { %500 = vrot.lane.b32.xlu0 %v340_v29, %s3746_s27  ;;  %397 = vrot.lane.b32.xlu1 %v3868_v23, %s3741_s9 }
  0x35   : > { %418 = vrot.lane.b32.xlu0 %v3854_v18, %s3740_s8  ;;  %441 = vrot.lane.b32.xlu1 %v340_v29, %s3745_s17 }
  0x39   : > { %458 = vrot.lane.b32.xlu0 %v3904_v33, %s3743_s11  ;;  %479 = vrot.lane.b32.xlu1 %v3877_v27, %s3742_s10 }
  0x3d   : > { %502 = vrot.lane.b32.xlu0 %v347_v37, %s3746_s27  ;;  %375 = vrot.lane.b32.xlu1 %v340_v29, %s3744_s14  ;;  %v4015_v29 = vshrl.u32 %v647_v20, 7 }
  0x3f   : > { %v4022_v35 = vsub.s32 %v646_v28, %v4015_v29 }
  0x41   : > { %399 = vrot.lane.b32.xlu0 %v3904_v33, %s3741_s9  ;;  %420 = vrot.lane.b32.xlu1 %v3877_v27, %s3740_s8 }
  0x45   : > { %443 = vrot.lane.b32.xlu0 %v347_v37, %s3745_s17  ;;  %460 = vrot.lane.b32.xlu1 %v3931_v41, %s3743_s11 }
  0x49   : > { %481 = vrot.lane.b32.xlu0 %v3917_v38, %s3742_s10  ;;  %504 = vrot.lane.b32.xlu1 %v354_v44, %s3746_s27 }
  0x4d   : > { %377 = vrot.lane.b32.xlu0 %v347_v37, %s3744_s14  ;;  %401 = vrot.lane.b32.xlu1 %v3931_v41, %s3741_s9 }
  0x51   : > { %422 = vrot.lane.b32.xlu0 %v3917_v38, %s3740_s8  ;;  %445 = vrot.lane.b32.xlu1 %v354_v44, %s3745_s17 }
  0x55   : > { %462 = vrot.lane.b32.xlu0 %v3950_v47, %s3743_s11  ;;  %483 = vrot.lane.b32.xlu1 %v3941_v45, %s3742_s10 }
  0x59   : > { %379 = vrot.lane.b32.xlu0 %v354_v44, %s3744_s14  ;;  %506 = vrot.lane.b32.xlu1 %v361_v50, %s3746_s27 }
  0x5d   : > { %403 = vrot.lane.b32.xlu0 %v3950_v47, %s3741_s9  ;;  %424 = vrot.lane.b32.xlu1 %v3941_v45, %s3740_s8 }
  0x61   : > { %447 = vrot.lane.b32.xlu0 %v361_v50, %s3745_s17  ;;  %464 = vrot.lane.b32.xlu1 %v3969_v53, %s3743_s11 }
  0x65   : > { %485 = vrot.lane.b32.xlu0 %v3959_v51, %s3742_s10  ;;  %508 = vrot.lane.b32.xlu1 %v368_v56, %s3746_s27 }
  0x69   : > { %381 = vrot.lane.b32.xlu0 %v361_v50, %s3744_s14  ;;  %405 = vrot.lane.b32.xlu1 %v3969_v53, %s3741_s9 }
  0x6d   : > { %426 = vrot.lane.b32.xlu0 %v3959_v51, %s3740_s8  ;;  %449 = vrot.lane.b32.xlu1 %v368_v56, %s3745_s17 }
  0x71   : > { %466 = vrot.lane.b32.xlu0 %v3985_v59, %s3743_s11  ;;  %487 = vrot.lane.b32.xlu1 %v3662_v57, %s3742_s10 }
  0x75   : > { %383 = vrot.lane.b32.xlu0 %v368_v56, %s3744_s14  ;;  %510 = vrot.lane.b32.xlu1 %v436_v62, %s3746_s27 }
  0x79   : > { %407 = vrot.lane.b32.xlu0 %v3985_v59, %s3741_s9  ;;  %428 = vrot.lane.b32.xlu1 %v3662_v57, %s3740_s8 }
  0x7d   : > { %451 = vrot.lane.b32.xlu0 %v436_v62, %s3745_s17  ;;  %468 = vrot.lane.b32.xlu1 %v4000_v1, %s3743_s11 }
  0x81   : > { %489 = vrot.lane.b32.xlu0 %v3992_v63, %s3742_s10  ;;  %512 = vrot.lane.b32.xlu1 %v497_v7, %s3746_s27 }
  0x87   : > { %v417_v8 = vpop.permute.xlu0 %416  ;;  %v415_v9 = vpop.permute.xlu1 %414 }
  0x8b   : > { %v394_v10 = vpop.permute.xlu0 %393  ;;  %v476_v11 = vpop.permute.xlu1 %475 }
  0x8f   : > { %v396_v12 = vpop.permute.xlu0 %395  ;;  %v455_v13 = vpop.permute.xlu1 %454 }
  0x93   : > { %v370_v14 = vpop.permute.xlu0 %369  ;;  %v372_v15 = vpop.permute.xlu1 %371 }
  0x94   : > { %v517_v16 = vsel %vm515_vm0, %v3836_v4, %v370_v14  ;;  %v519_v25 = vsel %vm515_vm0, %v3831_v3, %v372_v15 }
  0x95   : > { %v534_v21 = vsel %vm532_vm1, %v517_v16, %v394_v10  ;;  %v536_v31 = vsel %vm532_vm1, %v519_v25, %v396_v12 }
  0x96   : > { %v551_v22 = vsel %vm549_vm2, %v534_v21, %v415_v9  ;;  %v553_v37 = vsel %vm549_vm2, %v536_v31, %v417_v8 }
  0x97   : > { %v440_v24 = vpop.permute.xlu0 %439  ;;  %v438_v26 = vpop.permute.xlu1 %437 }
  0x98   : > { %v568_v4 = vsel %vm566_vm3, %v551_v22, %v438_v26  ;;  %v570_v48 = vsel %vm566_vm3, %v553_v37, %v440_v24 }
  0x99   : > { %v585_v30 = vsel %vm583_vm4, %v568_v4, %v455_v13 }
  0x9a   : > { %v602_v32 = vsel %vm600_vm5, %v585_v30, %v476_v11 }
  0x9b   : > { %v457_v34 = vpop.permute.xlu0 %456  ;;  %v499_v36 = vpop.permute.xlu1 %498 }
  0x9c   : > { %v619_v3 = vsel %vm617_vm6, %v602_v32, %v499_v36  ;;  %v587_v52 = vsel %vm583_vm4, %v570_v48, %v457_v34 }
  0x9d   : > { %v642_v39 = vcombine.low %v619_v3, %v3868_v23  ;;  %v643_v40 = vcombine.high %v619_v3, %v3868_v23 }
  0x9f   : > { %v478_v42 = vpop.permute.xlu0 %477  ;;  %v650_v43 = vrot.slane %v642_v39, %v4022_v35  ;;  %v657_v44 = vrot.slane %v643_v40, %v4022_v35  ;;  %v374_v46 = vpop.permute.xlu1 %373 }
  0xa0   : > { %v604_v54 = vsel %vm600_vm5, %v587_v52, %v478_v42  ;;  %v521_v60 = vsel %vm515_vm0, %v3827_v2, %v374_v46 }
  0xa1   : > { %v658_v49 = vcombine.high %v650_v43, %v650_v43  ;;  %v659_v50 = vcombine.high %v657_v44, %v657_v44  ;;  %v666_v56 = vrot.slane %v650_v43, %v4022_v35  ;;  %v673_v0 = vrot.slane %v657_v44, %v4022_v35 }
  0xa3   : > { %v501_v55 = vpop.permute.xlu0 %500  ;;  %v680_v57 = vrot.slane %v658_v49, %v4022_v35  ;;  %v398_v23 = vpop.permute.xlu1 %397  ;;  %v687_v5 = vrot.slane %v659_v50, %v4022_v35  ;;  %v689_v16 = vcombine.high %v673_v0, %v673_v0 }
  0xa4   : > { %v621_v58 = vsel %vm617_vm6, %v604_v54, %v501_v55  ;;  %v538_v8 = vsel %vm532_vm1, %v521_v60, %v398_v23 }
  0xa5   : > { %v691_v61 = vcombine.low %v621_v58, %v3904_v33  ;;  %v692_v62 = vcombine.high %v621_v58, %v3904_v33  ;;  %v1059_v6 = vcombine.low %v666_v56, %v680_v57  ;;  %v3408_v7 = vcombine.high %v666_v56, %v680_v57 }
  0xa6   : > { %v1061_v17 = vcombine.low %v673_v0, %v687_v5 }
  0xa7   : > { %v699_v9 = vrot.slane %v691_v61, %v4022_v35  ;;  %v706_v10 = vrot.slane %v692_v62, %v4022_v35  ;;  %v419_v11 = vpop.permute.xlu0 %418  ;;  %v442_v12 = vpop.permute.xlu1 %441  ;;  %v1069_v33 = vrot.slane %v1059_v6, %v4022_v35  ;;  %v1076_v15 = vrot.slane %v3408_v7, %v4022_v35 }
  0xa8   : > { %v555_v2 = vsel %vm549_vm2, %v538_v8, %v419_v11  ;;  %v1083_v31 = vrot.slane %v1061_v17, %v4022_v35 }
  0xa9   : > { %v707_v13 = vcombine.high %v699_v9, %v699_v9  ;;  %v715_v14 = vrot.slane %v699_v9, %v4022_v35  ;;  %v708_v19 = vcombine.high %v706_v10, %v706_v10  ;;  %v572_v21 = vsel %vm566_vm3, %v555_v2, %v442_v12 }
  0xaa   : > { %v722_v28 = vrot.slane %v706_v10, %v4022_v35  ;;  %v1092_v4 = vcombine.high %v1069_v33, %v1076_v15  ;;  %v1091_v34 = vcombine.low %v1069_v33, %v1076_v15 }
  0xab   : > { %v729_v20 = vrot.slane %v707_v13, %v4022_v35  ;;  %v459_v22 = vpop.permute.xlu0 %458  ;;  %v1062_v24 = vcombine.low %v689_v16, %v715_v14  ;;  %v480_v25 = vpop.permute.xlu1 %479  ;;  %v736_v36 = vrot.slane %v708_v19, %v4022_v35  ;;  %v737_v39 = vcombine.high %v715_v14, %v715_v14 }
  0xac   : > { %v589_v26 = vsel %vm583_vm4, %v572_v21, %v459_v22  ;;  %v738_v46 = vcombine.high %v722_v28, %v722_v28  ;;  %v1108_v50 = vrot.slane %v1092_v4, %v4022_v35  ;;  %v1101_v55 = vrot.slane %v1091_v34, %v4022_v35 }
  0xad   : > { %v739_v30 = vcombine.high %v729_v20, %v729_v20  ;;  %v1090_v32 = vrot.slane %v1062_v24, %v4022_v35  ;;  %v606_v3 = vsel %vm600_vm5, %v589_v26, %v480_v25  ;;  %v1125_v61 = vcombine.low %v729_v20, %v737_v39 }
  0xae   : > { %v1127_v7 = vcombine.low %v736_v36, %v738_v46 }
  0xaf   : > { %v503_v37 = vpop.permute.xlu0 %502  ;;  %v376_v40 = vpop.permute.xlu1 %375  ;;  %v1094_v43 = vcombine.high %v1083_v31, %v1090_v32  ;;  %v1093_v44 = vcombine.low %v1083_v31, %v1090_v32  ;;  %v1126_v52 = vcombine.low %v739_v30, %v722_v28  ;;  %v1135_v2 = vrot.slane %v1125_v61, %v4022_v35 }
  0xb0   : > { %v623_v42 = vsel %vm617_vm6, %v606_v3, %v503_v37  ;;  %v523_v57 = vsel %vm515_vm0, %v3854_v18, %v376_v40  ;;  %v1149_v17 = vrot.slane %v1127_v7, %v4022_v35 }
  0xb1   : > { %v740_v48 = vcombine.low %v623_v42, %v3931_v41  ;;  %v741_v49 = vcombine.high %v623_v42, %v3931_v41  ;;  %v1122_v54 = vrot.slane %v1094_v43, %v4022_v35  ;;  %v1115_v56 = vrot.slane %v1093_v44, %v4022_v35 }
  0xb2   : > { %v1142_v8 = vrot.slane %v1126_v52, %v4022_v35 }
  0xb3   : > { %v748_v23 = vrot.slane %v740_v48, %v4022_v35  ;;  %v755_v58 = vrot.slane %v741_v49, %v4022_v35  ;;  %v400_v60 = vpop.permute.xlu0 %399  ;;  %v421_v62 = vpop.permute.xlu1 %420  ;;  %v1124_v0 = vcombine.low %v1108_v50, %v1122_v54  ;;  %v1123_v5 = vcombine.low %v1101_v55, %v1115_v56 }
  0xb4   : > { %v540_v41 = vsel %vm532_vm1, %v523_v57, %v400_v60  ;;  %v1158_v15 = vcombine.high %v1135_v2, %v1142_v8  ;;  %v1157_v16 = vcombine.low %v1135_v2, %v1142_v8 }
  0xb5   : > { %v756_v6 = vcombine.high %v748_v23, %v748_v23  ;;  %3421 = vmatprep.mubr.msk.bf16.mxu0 %vm515_vm0, %v1124_v0  ;;  %v757_v9 = vcombine.high %v755_v58, %v755_v58  ;;  %v764_v18 = vrot.slane %v748_v23, %v4022_v35  ;;  %v557_v11 = vsel %vm549_vm2, %v540_v41, %v421_v62 }
  0xb6   : > { %1636 = vmatmul.mubr.bf16.vlgmr.msra.gmra.mrb[0].mxu0 %v1123_v5  ;;  %v771_v26 = vrot.slane %v755_v58, %v4022_v35  ;;  %v1174_v32 = vrot.slane %v1158_v15, %v4022_v35  ;;  %v1167_v34 = vrot.slane %v1157_v16, %v4022_v35 }
  0xb7   : > { %v778_v10 = vrot.slane %v756_v6, %v4022_v35  ;;  %v444_v12 = vpop.permute.xlu0 %443  ;;  %v461_v13 = vpop.permute.xlu1 %460  ;;  %v785_v19 = vrot.slane %v757_v9, %v4022_v35 }
  0xb8   : > { %v574_v14 = vsel %vm566_vm3, %v557_v11, %v444_v12  ;;  %v787_v52 = vcombine.high %v771_v26, %v771_v26 }
  0xb9   : > { %v1128_v33 = vcombine.low %v764_v18, %v778_v10  ;;  %v591_v21 = vsel %vm583_vm4, %v574_v14, %v461_v13  ;;  %v3409_v36 = vcombine.high %v764_v18, %v778_v10  ;;  %v1192_v3 = vcombine.low %v771_v26, %v785_v19 }
  0xbb   : > { %v1156_v20 = vrot.slane %v1128_v33, %v4022_v35  ;;  %v482_v22 = vpop.permute.xlu0 %481  ;;  %v505_v24 = vpop.permute.xlu1 %504  ;;  %v1201_v54 = vrot.slane %v3409_v36, %v4022_v35  ;;  %v1208_v55 = vrot.slane %v1192_v3, %v4022_v35 }
  0xbc   : > { %v608_v25 = vsel %vm600_vm5, %v591_v21, %v482_v22 }
  0xbd   : > { %v625_v28 = vsel %vm617_vm6, %v608_v25, %v505_v24  ;;  %v1160_v4 = vcombine.high %v1149_v17, %v1156_v20  ;;  %v1159_v30 = vcombine.low %v1149_v17, %v1156_v20  ;;  %v1224_v6 = vcombine.high %v1201_v54, %v1208_v55 }
  0xbe   : > { %v789_v31 = vcombine.low %v625_v28, %v3950_v47  ;;  %v790_v56 = vcombine.high %v625_v28, %v3950_v47  ;;  %v1223_v18 = vcombine.low %v1201_v54, %v1208_v55 }
  0xbf   : > { %v378_v37 = vpop.permute.xlu0 %377  ;;  %v1188_v39 = vrot.slane %v1160_v4, %v4022_v35  ;;  %v1181_v40 = vrot.slane %v1159_v30, %v4022_v35  ;;  %v402_v43 = vpop.permute.xlu1 %401  ;;  %v1240_v33 = vrot.slane %v1224_v6, %v4022_v35 }
  0xc0   : > { %v797_v42 = vrot.slane %v789_v31, %v4022_v35  ;;  %v525_v44 = vsel %vm515_vm0, %v3877_v27, %v378_v37  ;;  %v804_v0 = vrot.slane %v790_v56, %v4022_v35  ;;  %v1233_v19 = vrot.slane %v1223_v18, %v4022_v35 }
  0xc1   : > { %v1190_v46 = vcombine.low %v1174_v32, %v1188_v39  ;;  %v1189_v48 = vcombine.low %v1167_v34, %v1181_v40  ;;  %v542_v27 = vsel %vm532_vm1, %v525_v44, %v402_v43 }
  0xc2   : > { %v805_v49 = vcombine.high %v797_v42, %v797_v42  ;;  %v813_v50 = vrot.slane %v797_v42, %v4022_v35  ;;  %v806_v2 = vcombine.high %v804_v0, %v804_v0  ;;  %v820_v13 = vrot.slane %v804_v0, %v4022_v35 }
  0xc3   : > { %3422 = vmatprep.mubr.msk.bf16.mxu0 %vm515_vm0, %v1190_v46  ;;  %v423_v57 = vpop.permute.xlu0 %422  ;;  %v446_v60 = vpop.permute.xlu1 %445 }
  0xc4   : > { %v827_v23 = vrot.slane %v805_v49, %v4022_v35  ;;  %v835_v58 = vcombine.high %v813_v50, %v813_v50  ;;  %1644 = vmatmul.mubr.bf16.gmra.mrb[4].mxu0 %v1189_v48  ;;  %v1193_v61 = vcombine.low %v787_v52, %v813_v50  ;;  %v559_v62 = vsel %vm549_vm2, %v542_v27, %v423_v57 }
  0xc5   : > { %v576_v8 = vsel %vm566_vm3, %v559_v62, %v446_v60  ;;  %v834_v28 = vrot.slane %v806_v2, %v4022_v35  ;;  %v836_v4 = vcombine.high %v820_v13, %v820_v13 }
  0xc6   : > { %v1194_v41 = vcombine.low %v827_v23, %v835_v58  ;;  %v1215_v47 = vrot.slane %v1193_v61, %v4022_v35  ;;  %v837_v21 = vcombine.high %v827_v23, %v827_v23 }
  0xc7   : > { %v463_v5 = vpop.permute.xlu0 %462  ;;  %v484_v7 = vpop.permute.xlu1 %483  ;;  %v1258_v40 = vcombine.low %v834_v28, %v836_v4 }
  0xc8   : > { %v1222_v9 = vrot.slane %v1194_v41, %v4022_v35  ;;  %v593_v10 = vsel %vm583_vm4, %v576_v8, %v463_v5  ;;  %v1257_v37 = vcombine.low %v837_v21, %v820_v13 }
  0xc9   : > { %v610_v16 = vsel %vm600_vm5, %v593_v10, %v484_v7  ;;  %v1274_v57 = vrot.slane %v1258_v40, %v4022_v35 }
  0xca   : > { %v1226_v11 = vcombine.high %v1215_v47, %v1222_v9  ;;  %v1225_v12 = vcombine.low %v1215_v47, %v1222_v9  ;;  %v1267_v49 = vrot.slane %v1257_v37, %v4022_v35 }
  0xcb   : > { %v380_v14 = vpop.permute.xlu0 %379  ;;  %v507_v15 = vpop.permute.xlu1 %506 }
  0xcc   : > { %v1254_v17 = vrot.slane %v1226_v11, %v4022_v35  ;;  %v1247_v20 = vrot.slane %v1225_v12, %v4022_v35  ;;  %v627_v22 = vsel %vm617_vm6, %v610_v16, %v507_v15  ;;  %v527_v31 = vsel %vm515_vm0, %v3917_v38, %v380_v14 }
  0xcd   : > { %v838_v24 = vcombine.low %v627_v22, %v3969_v53  ;;  %v839_v30 = vcombine.high %v627_v22, %v3969_v53  ;;  %v1290_v62 = vcombine.high %v1267_v49, %v1274_v57  ;;  %v1289_v41 = vcombine.low %v1267_v49, %v1274_v57 }
  0xce   : > { %v1256_v25 = vcombine.low %v1240_v33, %v1254_v17  ;;  %v1255_v26 = vcombine.low %v1233_v19, %v1247_v20 }
  0xcf   : > { %v404_v32 = vpop.permute.xlu0 %403  ;;  %v846_v34 = vrot.slane %v838_v24, %v4022_v35  ;;  %v425_v36 = vpop.permute.xlu1 %424  ;;  %v853_v42 = vrot.slane %v839_v30, %v4022_v35  ;;  %v1306_v2 = vrot.slane %v1290_v62, %v4022_v35  ;;  %v1299_v13 = vrot.slane %v1289_v41, %v4022_v35 }
  0xd0   : > { %v544_v3 = vsel %vm532_vm1, %v527_v31, %v404_v32  ;;  %3423 = vmatprep.mubr.msk.bf16.mxu0 %vm515_vm0, %v1256_v25 }
  0xd1   : > { %1652 = vmatmul.mubr.bf16.gmra.mrb[8].mxu0 %v1255_v26  ;;  %v854_v39 = vcombine.high %v846_v34, %v846_v34  ;;  %v561_v43 = vsel %vm549_vm2, %v544_v3, %v425_v36  ;;  %v862_v44 = vrot.slane %v846_v34, %v4022_v35  ;;  %v855_v54 = vcombine.high %v853_v42, %v853_v42 }
  0xd2   : > { %v869_v7 = vrot.slane %v853_v42, %v4022_v35 }
  0xd3   : > { %v448_v53 = vpop.permute.xlu0 %447  ;;  %v876_v38 = vrot.slane %v854_v39, %v4022_v35  ;;  %v465_v46 = vpop.permute.xlu1 %464  ;;  %v883_v8 = vrot.slane %v855_v54, %v4022_v35 }
  0xd4   : > { %v578_v48 = vsel %vm566_vm3, %v561_v43, %v448_v53  ;;  %v885_v16 = vcombine.high %v869_v7, %v869_v7 }
  0xd5   : > { %v1259_v50 = vcombine.low %v862_v44, %v876_v38  ;;  %v3410_v52 = vcombine.high %v862_v44, %v876_v38  ;;  %v595_v55 = vsel %vm583_vm4, %v578_v48, %v465_v46  ;;  %v1323_v17 = vcombine.low %v869_v7, %v883_v8 }
  0xd7   : > { %v486_v56 = vpop.permute.xlu0 %485  ;;  %v1281_v23 = vrot.slane %v1259_v50, %v4022_v35  ;;  %v1288_v58 = vrot.slane %v3410_v52, %v4022_v35  ;;  %v509_v60 = vpop.permute.xlu1 %508  ;;  %v1333_v32 = vrot.slane %v1323_v17, %v4022_v35  ;;  %v514_v17 = vrot.slane %v3992_v63, 1 }
  0xd8   : > { %v612_v27 = vsel %vm600_vm5, %v595_v55, %v486_v56 }
  0xd9   : > { %v629_v61 = vsel %vm617_vm6, %v612_v27, %v509_v60  ;;  %v1292_v6 = vcombine.high %v1281_v23, %v1288_v58  ;;  %v1291_v47 = vcombine.low %v1281_v23, %v1288_v58 }
  0xda   : > { %v887_v0 = vcombine.low %v629_v61, %v3985_v59  ;;  %v888_v5 = vcombine.high %v629_v61, %v3985_v59 }
  0xdb   : > { %v382_v9 = vpop.permute.xlu0 %381  ;;  %v406_v10 = vpop.permute.xlu1 %405  ;;  %v1320_v11 = vrot.slane %v1292_v6, %v4022_v35  ;;  %v1313_v59 = vrot.slane %v1291_v47, %v4022_v35 }
  0xdc   : > { %v895_v18 = vrot.slane %v887_v0, %v4022_v35  ;;  %v529_v12 = vsel %vm515_vm0, %v3941_v45, %v382_v9  ;;  %v902_v14 = vrot.slane %v888_v5, %v4022_v35 }
  0xdd   : > { %v1322_v19 = vcombine.low %v1306_v2, %v1320_v11  ;;  %v1321_v21 = vcombine.low %v1299_v13, %v1313_v59  ;;  %v546_v25 = vsel %vm532_vm1, %v529_v12, %v406_v10 }
  0xde   : > { %v903_v33 = vcombine.high %v895_v18, %v895_v18  ;;  %v911_v15 = vrot.slane %v895_v18, %v4022_v35  ;;  %v918_v4 = vrot.slane %v902_v14, %v4022_v35  ;;  %v904_v44 = vcombine.high %v902_v14, %v902_v14 }
  0xdf   : > { %v427_v20 = vpop.permute.xlu0 %426  ;;  %v450_v45 = vpop.permute.xlu1 %449  ;;  %3424 = vmatprep.mubr.msk.bf16.mxu0 %vm515_vm0, %v1322_v19 }
  0xe0   : > { %v925_v22 = vrot.slane %v903_v33, %v4022_v35  ;;  %v933_v24 = vcombine.high %v911_v15, %v911_v15  ;;  %v1324_v26 = vcombine.low %v885_v16, %v911_v15  ;;  %v563_v28 = vsel %vm549_vm2, %v546_v25, %v427_v20  ;;  %1660 = vmatmul.mubr.bf16.gmra.mrb[12].mxu0 %v1321_v21 }
  0xe1   : > { %v580_v39 = vsel %vm566_vm3, %v563_v28, %v450_v45  ;;  %v932_v27 = vrot.slane %v904_v44, %v4022_v35  ;;  %v934_v61 = vcombine.high %v918_v4, %v918_v4 }
  0xe2   : > { %v935_v30 = vcombine.high %v925_v22, %v925_v22  ;;  %v1325_v31 = vcombine.low %v925_v22, %v933_v24  ;;  %v1340_v34 = vrot.slane %v1324_v26, %v4022_v35 }
  0xe3   : > { %v467_v36 = vpop.permute.xlu0 %466  ;;  %v488_v37 = vpop.permute.xlu1 %487  ;;  %v1389_v18 = vcombine.low %v932_v27, %v934_v61 }
  0xe4   : > { %v1326_v3 = vcombine.low %v935_v30, %v918_v4  ;;  %v597_v40 = vsel %vm583_vm4, %v580_v39, %v467_v36  ;;  %v1356_v42 = vcombine.high %v1333_v32, %v1340_v34  ;;  %v1347_v53 = vrot.slane %v1325_v31, %v4022_v35 }
  0xe5   : > { %v1355_v46 = vcombine.low %v1333_v32, %v1340_v34  ;;  %v614_v49 = vsel %vm600_vm5, %v597_v40, %v488_v37  ;;  %v1399_v21 = vrot.slane %v1389_v18, %v4022_v35 }
  0xe6   : > { %v1354_v43 = vrot.slane %v1326_v3, %v4022_v35  ;;  %v1372_v56 = vrot.slane %v1356_v42, %v4022_v35 }
  0xe7   : > { %v384_v38 = vpop.permute.xlu0 %383  ;;  %v511_v48 = vpop.permute.xlu1 %510  ;;  %v1365_v41 = vrot.slane %v1355_v46, %v4022_v35 }
  0xe8   : > { %v1358_v50 = vcombine.high %v1347_v53, %v1354_v43  ;;  %v1357_v52 = vcombine.low %v1347_v53, %v1354_v43  ;;  %v631_v54 = vsel %vm617_vm6, %v614_v49, %v511_v48  ;;  %v531_v55 = vsel %vm515_vm0, %v3959_v51, %v384_v38 }
  0xe9   : > { %v936_v57 = vcombine.low %v631_v54, %v4000_v1  ;;  %v937_v23 = vcombine.high %v631_v54, %v4000_v1 }
  0xea   : > { %v1386_v58 = vrot.slane %v1358_v50, %v4022_v35  ;;  %v1379_v60 = vrot.slane %v1357_v52, %v4022_v35 }
  0xeb   : > { %v408_v62 = vpop.permute.xlu0 %407  ;;  %v944_v0 = vrot.slane %v936_v57, %v4022_v35  ;;  %v951_v51 = vrot.slane %v937_v23, %v4022_v35  ;;  %v429_v6 = vpop.permute.xlu1 %428 }
  0xec   : > { %v548_v5 = vsel %vm532_vm1, %v531_v55, %v408_v62  ;;  %v1388_v47 = vcombine.low %v1372_v56, %v1386_v58  ;;  %v1387_v7 = vcombine.low %v1365_v41, %v1379_v60 }
  0xed   : > { %v565_v1 = vsel %vm549_vm2, %v548_v5, %v429_v6  ;;  %v952_v8 = vcombine.high %v944_v0, %v944_v0  ;;  %v953_v9 = vcombine.high %v951_v51, %v951_v51  ;;  %v960_v10 = vrot.slane %v944_v0, %v4022_v35 }
  0xee   : > { %3425 = vmatprep.mubr.msk.bf16.mxu0 %vm515_vm0, %v1388_v47  ;;  %v967_v12 = vrot.slane %v951_v51, %v4022_v35 }
  0xef   : > { %1668 = vmatmul.mubr.bf16.gmra.mrb[16].mxu0 %v1387_v7  ;;  %v452_v11 = vpop.permute.xlu0 %451  ;;  %v974_v2 = vrot.slane %v952_v8, %v4022_v35  ;;  %v981_v13 = vrot.slane %v953_v9, %v4022_v35  ;;  %v469_v14 = vpop.permute.xlu1 %468 }
  0xf0   : > { %v582_v59 = vsel %vm566_vm3, %v565_v1, %v452_v11  ;;  %v983_v46 = vcombine.high %v967_v12, %v967_v12 }
  0xf1   : > { %v1390_v33 = vcombine.low %v960_v10, %v974_v2  ;;  %v3411_v15 = vcombine.high %v960_v10, %v974_v2  ;;  %v1392_v16 = vcombine.low %v967_v12, %v981_v13  ;;  %v599_v19 = vsel %vm583_vm4, %v582_v59, %v469_v14  ;;  %v4207_v2 = vld [vmem:[%s4694_s2] ss:$0 sm:$0xff] }
  0xf2   : > { %v3748_v10 = vmov 1983009808  }
  0xf3   : > { %v490_v20 = vpop.permute.xlu0 %489  ;;  %v1406_v22 = vrot.slane %v1390_v33, %v4022_v35  ;;  %v1413_v24 = vrot.slane %v3411_v15, %v4022_v35  ;;  %v1420_v45 = vrot.slane %v1392_v16, %v4022_v35  ;;  %v513_v26 = vpop.permute.xlu1 %512  ;;  %v1722_v11 = vunpack.c.l.s4 %v3748_v10 }
  0xf4   : > { %v616_v25 = vsel %vm600_vm5, %v599_v19, %v490_v20 }
  0xf5   : > { %v633_v28 = vsel %vm617_vm6, %v616_v25, %v513_v26  ;;  %v1422_v31 = vcombine.high %v1399_v21, %v1406_v22  ;;  %v1424_v63 = vcombine.high %v1413_v24, %v1420_v45  ;;  %v1421_v32 = vcombine.low %v1399_v21, %v1406_v22 }
  0xf6   : > { %v985_v4 = vcombine.low %v633_v28, %v514_v17  ;;  %v986_v30 = vcombine.high %v633_v28, %v514_v17  ;;  %v1423_v34 = vcombine.low %v1413_v24, %v1420_v45  ;;  %v1723_v12 = vunpack.c.0.s8 %v1722_v11 }
  0xf7   : > { %v1438_v37 = vrot.slane %v1422_v31, %v4022_v35  ;;  %v1452_v39 = vrot.slane %v1424_v63, %v4022_v35  ;;  %v1431_v40 = vrot.slane %v1421_v32, %v4022_v35 }
  0xf8   : > { %v993_v36 = vrot.slane %v985_v4, %v4022_v35  ;;  %v1000_v3 = vrot.slane %v986_v30, %v4022_v35  ;;  %v1445_v42 = vrot.slane %v1423_v34, %v4022_v35  ;;  %v4211_v14 = vsub.s32 %v1723_v12, %v4015_v29 }
  0xf9   : > { %v1454_v48 = vcombine.low %v1438_v37, %v1452_v39 }
  0xfa   : > { %v1001_v43 = vcombine.high %v993_v36, %v993_v36  ;;  %v1002_v53 = vcombine.high %v1000_v3, %v1000_v3  ;;  %v1009_v44 = vrot.slane %v993_v36, %v4022_v35  ;;  %v1016_v38 = vrot.slane %v1000_v3, %v4022_v35 }
  0xfb   : > { %v1453_v49 = vcombine.low %v1431_v40, %v1445_v42  ;;  %3426 = vmatprep.mubr.msk.bf16.mxu0 %vm515_vm0, %v1454_v48 }
  0xfc   : > { %v1023_v50 = vrot.slane %v1001_v43, %v4022_v35  ;;  %v1030_v52 = vrot.slane %v1002_v53, %v4022_v35  ;;  %v1031_v54 = vcombine.high %v1009_v44, %v1009_v44  ;;  %v1032_v55 = vcombine.high %v1016_v38, %v1016_v38 }
  0xfd   : > { %v1455_v56 = vcombine.low %v983_v46, %v1009_v44  ;;  %1676 = vmatmul.mubr.bf16.gmra.mrb[20].mxu0 %v1453_v49 }
  0xfe   : > { %v1033_v57 = vcombine.high %v1023_v50, %v1023_v50  ;;  %v1456_v23 = vcombine.low %v1023_v50, %v1031_v54  ;;  %v1458_v58 = vcombine.low %v1030_v52, %v1032_v55 }
  0xff   : > { %v1465_v27 = vrot.slane %v1455_v56, %v4022_v35 }
 0x100   : > { %v1457_v60 = vcombine.low %v1033_v57, %v1016_v38  ;;  %v1472_v61 = vrot.slane %v1456_v23, %v4022_v35  ;;  %v1486_v41 = vrot.slane %v1458_v58, %v4022_v35 }
 0x102   : > { %v1479_v62 = vrot.slane %v1457_v60, %v4022_v35  ;;  %v1488_v0 = vcombine.high %v1465_v27, %v1472_v61  ;;  %v1487_v51 = vcombine.low %v1465_v27, %v1472_v61 }
 0x104   : > { %v1490_v5 = vcombine.high %v1479_v62, %v1486_v41  ;;  %v1489_v6 = vcombine.low %v1479_v62, %v1486_v41  ;;  %v1504_v47 = vrot.slane %v1488_v0, %v4022_v35  ;;  %v1497_v7 = vrot.slane %v1487_v51, %v4022_v35 }
 0x106   : > { %v1518_v1 = vrot.slane %v1490_v5, %v4022_v35  ;;  %v1511_v8 = vrot.slane %v1489_v6, %v4022_v35 }
 0x108   : > { %v1520_v9 = vcombine.low %v1504_v47, %v1518_v1  ;;  %v1519_v18 = vcombine.low %v1497_v7, %v1511_v8 }
 0x10a   : > { %3427 = vmatprep.mubr.msk.bf16.mxu0 %vm515_vm0, %v1520_v9 }
 0x10b   : > { %1684 = vmatmul.mubr.bf16.gmra.mrb[24].mxu0 %v1519_v18 }
 0x189   : > { %v1637_v13 = vpop.f32.mrb[0].mxu0 }
 0x18a   : > { %v1638_v59 = vadd.f32 %v4207_v2, %v1637_v13  ;;  %v1639_v35 = vpop.f32.mrb[1].mxu0 }
 0x18b   : > { %v1640_v33 = vpop.f32.mrb[2].mxu0 }
 0x18c   : > { %v1692_v15 = vmax.f32 %v1638_v59, 0.0  ;;  %v1641_v16 = vadd.f32 %v4207_v2, %v1640_v33  ;;  %v1642_v17 = vpop.f32.mrb[3].mxu0 }
 0x18e   : > { %v1720_v19 = vcombine.high %v1692_v15, %v1692_v15  ;;  %v1727_v20 = vrot.slane %v1692_v15, %v4211_v14  ;;  %v1693_v21 = vmax.f32 %v1641_v16, 0.0 }
 0x190   : > { %v1734_v22 = vrot.slane %v1720_v19, %v4211_v14  ;;  %v1735_v24 = vcombine.high %v1727_v20, %v1727_v20  ;;  %v1737_v45 = vcombine.high %v1693_v21, %v1693_v21  ;;  %v1744_v25 = vrot.slane %v1693_v21, %v4211_v14 }
 0x192   : > { %v1736_v26 = vcombine.high %v1734_v22, %v1734_v22  ;;  %v1958_v28 = vcombine.low %v1727_v20, %v1735_v24  ;;  %v1751_v29 = vrot.slane %v1737_v45, %v4211_v14  ;;  %v1752_v4 = vcombine.high %v1744_v25, %v1744_v25 }
 0x194   : > { %v1959_v30 = vcombine.low %v1734_v22, %v1736_v26  ;;  %v1975_v31 = vcombine.low %v1744_v25, %v1752_v4  ;;  %v1966_v63 = vrot.slane %v1958_v28, %v4211_v14  ;;  %v1989_v36 = vrot.slane %v1751_v29, %v4211_v14 }
 0x195   : > { %v1753_v49 = vcombine.high %v1751_v29, %v1751_v29 }
 0x196   : > { %v1973_v32 = vrot.slane %v1959_v30, %v4211_v14  ;;  %v1982_v34 = vrot.slane %v1975_v31, %v4211_v14 }
 0x197   : > { %v1645_v3 = vpop.f32.mrb[4].mxu0 }
 0x198   : > { %v1646_v37 = vadd.f32 %v4207_v2, %v1645_v3  ;;  %v1647_v39 = vpop.f32.mrb[5].mxu0  ;;  %v1974_v40 = vcombine.low %v1966_v63, %v1973_v32  ;;  %v1990_v42 = vcombine.low %v1982_v34, %v1989_v36 }
 0x199   : > { %v1648_v43 = vpop.f32.mrb[6].mxu0 }
 0x19a   : > { %v1694_v53 = vmax.f32 %v1646_v37, 0.0  ;;  %v1649_v44 = vadd.f32 %v4207_v2, %v1648_v43  ;;  %v1650_v38 = vpop.f32.mrb[7].mxu0  ;;  %v3492_v46 = vpack.c.bf16 %v1974_v40, %v1974_v40  ;;  %v3493_v48 = vpack.c.bf16 %v1990_v42, %v1990_v42 }
 0x19c   : > { %v1754_v50 = vcombine.high %v1694_v53, %v1694_v53  ;;  %v1761_v52 = vrot.slane %v1694_v53, %v4211_v14  ;;  %v1695_v54 = vmax.f32 %v1649_v44, 0.0  ;;  %2303 = vst.msk [vmem:[#allocation2] sm:$0xf] %vm2302_vm7, %v3492_v46 }
 0x19d   : > { %2305 = vst.msk [vmem:[#allocation2 + $0x4] sm:$0x7] %vm2304_vm8, %v3493_v48 }
 0x19e   : > { %v1768_v55 = vrot.slane %v1754_v50, %v4211_v14  ;;  %v1769_v56 = vcombine.high %v1761_v52, %v1761_v52  ;;  %v1991_v57 = vcombine.low %v1753_v49, %v1761_v52  ;;  %v1771_v23 = vcombine.high %v1695_v54, %v1695_v54 }
 0x19f   : > { %v1778_v58 = vrot.slane %v1695_v54, %v4211_v14 }
 0x1a0   : > { %v1992_v60 = vcombine.low %v1769_v56, %v1768_v55  ;;  %v1770_v27 = vcombine.high %v1768_v55, %v1768_v55  ;;  %v1999_v62 = vrot.slane %v1991_v57, %v4211_v14  ;;  %v1785_v51 = vrot.slane %v1771_v23, %v4211_v14 }
 0x1a1   : > { %v1786_v61 = vcombine.high %v1778_v58, %v1778_v58 }
 0x1a2   : > { %v2006_v41 = vrot.slane %v1992_v60, %v4211_v14  ;;  %v2008_v0 = vcombine.low %v1770_v27, %v1778_v58  ;;  %v1787_v11 = vcombine.high %v1785_v51, %v1785_v51 }
 0x1a3   : > { %v2022_v47 = vrot.slane %v1786_v61, %v4211_v14 }
 0x1a4   : > { %v2007_v5 = vcombine.low %v1999_v62, %v2006_v41  ;;  %v2015_v6 = vrot.slane %v2008_v0, %v4211_v14  ;;  %v1653_v1 = vpop.f32.mrb[8].mxu0  ;;  %v2024_v17 = vcombine.low %v1785_v51, %v1787_v11 }
 0x1a5   : > { %v1654_v7 = vadd.f32 %v4207_v2, %v1653_v1  ;;  %v1655_v8 = vpop.f32.mrb[9].mxu0 }
 0x1a6   : > { %v3494_v9 = vpack.c.bf16 %v2007_v5, %v2007_v5  ;;  %v2023_v18 = vcombine.low %v2015_v6, %v2022_v47  ;;  %v1656_v10 = vpop.f32.mrb[10].mxu0  ;;  %v2032_v45 = vrot.slane %v2024_v17, %v4211_v14 }
 0x1a7   : > { %v1696_v12 = vmax.f32 %v1654_v7, 0.0  ;;  %v1657_v13 = vadd.f32 %v4207_v2, %v1656_v10  ;;  %v1658_v59 = vpop.f32.mrb[11].mxu0 }
 0x1a8   : > { %2306 = vst.msk [vmem:[#allocation2 + $0x8] sm:$0xf] %vm2302_vm7, %v3494_v9  ;;  %v3495_v35 = vpack.c.bf16 %v2023_v18, %v2023_v18 }
 0x1a9   : > { %v1788_v33 = vcombine.high %v1696_v12, %v1696_v12  ;;  %v1795_v15 = vrot.slane %v1696_v12, %v4211_v14  ;;  %v1697_v16 = vmax.f32 %v1657_v13, 0.0 }
 0x1aa   : > { %2307 = vst.msk [vmem:[#allocation2 + $0xc] sm:$0x7] %vm2304_vm8, %v3495_v35 }
 0x1ab   : > { %v1802_v19 = vrot.slane %v1788_v33, %v4211_v14  ;;  %v1803_v20 = vcombine.high %v1795_v15, %v1795_v15  ;;  %v1812_v24 = vrot.slane %v1697_v16, %v4211_v14  ;;  %v1805_v29 = vcombine.high %v1697_v16, %v1697_v16  ;;  %v3681_v33 = vld [vmem:[%s4695_s3 + $0x40] sm:$0xff]  }
 0x1ac   : > { %3585 = vmatprep.subr.bf16.mxu1 %v3681_v33  ;;  %3508 = vmatprep.subr.bf16.mxu0 %v3681_v33  ;;  %v3691_v33 = vld [vmem:[%s4695_s3 + $0x68] sm:$0xff]  }
 0x1ad   : > { %v1804_v21 = vcombine.high %v1802_v19, %v1802_v19  ;;  %v2025_v22 = vcombine.low %v1795_v15, %v1803_v20  ;;  %v2055_v30 = vrot.slane %v1812_v24, %v4211_v14  ;;  %v1819_v3 = vrot.slane %v1805_v29, %v4211_v14  ;;  %v3682_v15 = vld [vmem:[%s4695_s3] sm:$0xff]  }
 0x1ae   : > { %v1820_v37 = vcombine.high %v1812_v24, %v1812_v24  ;;  %3593 = vmatpush3.bf16.msra.mxu1 %v3682_v15  ;;  %3509 = vmatpush3.bf16.msra.mxu0 %v3682_v15 }
 0x1af   : > { %v2039_v25 = vrot.slane %v2025_v22, %v4211_v14  ;;  %v2041_v26 = vcombine.low %v1802_v19, %v1804_v21  ;;  %v1821_v54 = vcombine.high %v1819_v3, %v1819_v3 }
 0x1b0   : > { %v2057_v52 = vcombine.low %v1820_v37, %v1819_v3 }
 0x1b1   : > { %v2040_v28 = vcombine.low %v2032_v45, %v2039_v25  ;;  %v2048_v4 = vrot.slane %v2041_v26, %v4211_v14  ;;  %v4245_v31 = vld [vmem:[#allocation2 + $0x8] sm:$0x7f]  }
 0x1b2   : > { %v2421_v34 = vrot.slane %v4245_v31, 1  ;;  %v2376_v36 = vshll.u32 %v4245_v31, 16  ;;  %v2374_v53 = vshrl.u32 %v4245_v31, 16  ;;  %v2065_v61 = vrot.slane %v2057_v52, %v4211_v14 }
 0x1b3   : > { %v3496_v63 = vpack.c.bf16 %v2040_v28, %v2040_v28  ;;  %v2056_v32 = vcombine.low %v2048_v4, %v2055_v30  ;;  %v1661_v40 = vpop.f32.mrb[12].mxu0  ;;  %v3683_v30 = vld [vmem:[%s4695_s3 + $0x48] sm:$0xff]  }
 0x1b4   : > { %2428 = vrot.lane.b32.xlu0 %v2421_v34, %s3745_s17  ;;  %v1662_v42 = vadd.f32 %v4207_v2, %v1661_v40  ;;  %v1663_v43 = vpop.f32.mrb[13].mxu0  ;;  %v2378_v44 = vrot.slane %v2376_v36, 1  ;;  %3586 = vmatprep.subr.bf16.mxu1 %v3683_v30 }
 0x1b5   : > { %2308 = vst.msk [vmem:[#allocation2 + $0x10] sm:$0xf] %vm2302_vm7, %v3496_v63  ;;  %v3497_v39 = vpack.c.bf16 %v2056_v32, %v2056_v32  ;;  %v1664_v38 = vpop.f32.mrb[14].mxu0  ;;  %v3684_v63 = vld [vmem:[%s4695_s3 + $0x8] sm:$0xff]   ;;  %3510 = vmatprep.subr.bf16.mxu0 %v3683_v30 }
 0x1b6   : > { %v1698_v46 = vmax.f32 %v1662_v42, 0.0  ;;  %v1665_v48 = vadd.f32 %v4207_v2, %v1664_v38  ;;  %v1666_v49 = vpop.f32.mrb[15].mxu0  ;;  %v4258_v50 = vor.u32 %v2378_v44, %v2374_v53  ;;  %3594 = vmatpush3.bf16.msra.mxu1 %v3684_v63  ;;  %v3685_v53 = vld [vmem:[%s4695_s3 + $0x50] sm:$0xff]   ;;  %3511 = vmatpush3.bf16.msra.mxu0 %v3684_v63 }
 0x1b7   : > { %2309 = vst.msk [vmem:[#allocation2 + $0x14] sm:$0x7] %vm2304_vm8, %v3497_v39  ;;  %3587 = vmatprep.subr.bf16.mxu1 %v3685_v53  ;;  %3512 = vmatprep.subr.bf16.mxu0 %v3685_v53  ;;  %v3693_v53 = vld [vmem:[%s4695_s3 + $0x70] sm:$0xff]  }
 0x1b8   : > { %v1822_v55 = vcombine.high %v1698_v46, %v1698_v46  ;;  %v1829_v56 = vrot.slane %v1698_v46, %v4211_v14  ;;  %v1699_v57 = vmax.f32 %v1665_v48, 0.0  ;;  %2410 = vrot.lane.b32.xlu0 %v4258_v50, %s3741_s9  ;;  %v3686_v48 = vld [vmem:[%s4695_s3 + $0x10] sm:$0xff]  }
 0x1ba   : > { %v1836_v23 = vrot.slane %v1822_v55, %v4211_v14  ;;  %v1837_v58 = vcombine.high %v1829_v56, %v1829_v56  ;;  %v2058_v60 = vcombine.low %v1821_v54, %v1829_v56  ;;  %v1839_v27 = vcombine.high %v1699_v57, %v1699_v57  ;;  %3595 = vmatpush3.bf16.msra.mxu1 %v3686_v48 }
 0x1bb   : > { %v1846_v62 = vrot.slane %v1699_v57, %v4211_v14  ;;  %3513 = vmatpush3.bf16.msra.mxu0 %v3686_v48 }
 0x1bc   : > { %v1838_v41 = vcombine.high %v1836_v23, %v1836_v23  ;;  %v2072_v0 = vrot.slane %v2058_v60, %v4211_v14  ;;  %v2074_v51 = vcombine.low %v1837_v58, %v1836_v23  ;;  %v1853_v5 = vrot.slane %v1839_v27, %v4211_v14  ;;  %v3687_v58 = vld [vmem:[%s4695_s3 + $0x58] sm:$0xff]  }
 0x1bd   : > { %v1854_v47 = vcombine.high %v1846_v62, %v1846_v62  ;;  %3588 = vmatprep.subr.bf16.mxu1 %v3687_v58  ;;  %3514 = vmatprep.subr.bf16.mxu0 %v3687_v58 }
 0x1be   : > { %v4268_v6 = vld [vmem:[#allocation2 + $0x10] sm:$0x7f]   ;;  %v2073_v1 = vcombine.low %v2065_v61, %v2072_v0  ;;  %v2081_v7 = vrot.slane %v2074_v51, %v4211_v14  ;;  %v2088_v8 = vrot.slane %v1838_v41, %v4211_v14  ;;  %v1855_v9 = vcombine.high %v1853_v5, %v1853_v5 }
 0x1bf   : > { %2445 = vrot.lane.b32.xlu0 %v4268_v6, %s3742_s10  ;;  %v2090_v18 = vcombine.low %v1846_v62, %v1854_v47  ;;  %v4275_v10 = vrot.slane %v4268_v6, 1  ;;  %v2383_v11 = vshll.u32 %v4268_v6, 16  ;;  %v2381_v19 = vshrl.u32 %v4268_v6, 16  ;;  %v3688_v62 = vld [vmem:[%s4695_s3 + $0x18] sm:$0xff]  }
 0x1c0   : > { %v2089_v12 = vcombine.low %v2081_v7, %v2088_v8  ;;  %v3498_v13 = vpack.c.bf16 %v2073_v1, %v2073_v1  ;;  %v2091_v59 = vcombine.low %v1853_v5, %v1855_v9  ;;  %3596 = vmatpush3.bf16.msra.mxu1 %v3688_v62  ;;  %v3689_v8 = vld [vmem:[%s4695_s3 + $0x60] sm:$0xff]   ;;  %3515 = vmatpush3.bf16.msra.mxu0 %v3688_v62 }
 0x1c1   : > { %2465 = vrot.lane.b32.xlu1 %v4275_v10, %s3741_s9  ;;  %v2098_v21 = vrot.slane %v2090_v18, %v4211_v14  ;;  %v2385_v45 = vrot.slane %v2383_v11, 1  ;;  %v2604_v55 = vcombine.high %v4275_v10, %v4275_v10  ;;  %v2625_v41 = vrot.slane %v4275_v10, %v4211_v14  ;;  %v3690_v9 = vld [vmem:[%s4695_s3 + $0x20] sm:$0xff]   ;;  %3589 = vmatprep.subr.bf16.mxu1 %v3689_v8 }
 0x1c2   : > { %v1669_v35 = vpop.f32.mrb[16].mxu0  ;;  %v3499_v20 = vpack.c.bf16 %v2089_v12, %v2089_v12  ;;  %2310 = vst.msk [vmem:[#allocation2 + $0x18] sm:$0xf] %vm2302_vm7, %v3498_v13  ;;  %v2105_v22 = vrot.slane %v2091_v59, %v4211_v14  ;;  %3516 = vmatprep.subr.bf16.mxu0 %v3689_v8 }
 0x1c3   : > { %v1670_v16 = vadd.f32 %v4207_v2, %v1669_v35  ;;  %v1671_v17 = vpop.f32.mrb[17].mxu0  ;;  %2430 = vrot.lane.b32.xlu0 %v4275_v10, %s3745_s17  ;;  %v4295_v4 = vor.u32 %v2385_v45, %v2381_v19  ;;  %v2632_v47 = vrot.slane %v2604_v55, %v4211_v14  ;;  %v3695_v55 = vld [vmem:[%s4695_s3 + $0x78] sm:$0xff]  }
 0x1c4   : > { %v1672_v24 = vpop.f32.mrb[18].mxu0  ;;  %2311 = vst.msk [vmem:[#allocation2 + $0x1c] sm:$0x7] %vm2304_vm8, %v3499_v20  ;;  %v2106_v29 = vcombine.low %v2098_v21, %v2105_v22  ;;  %v4367_v20 = vrot.slane %v2625_v41, %v4211_v14  ;;  %3597 = vmatpush3.bf16.msra.mxu1 %v3690_v9  ;;  %v3692_v22 = vld [vmem:[%s4695_s3 + $0x28] sm:$0xff]   ;;  %3517 = vmatpush3.bf16.msra.mxu0 %v3690_v9 }
 0x1c5   : > { %v1700_v25 = vmax.f32 %v1670_v16, 0.0  ;;  %v1673_v26 = vadd.f32 %v4207_v2, %v1672_v24  ;;  %v1674_v28 = vpop.f32.mrb[19].mxu0  ;;  %3590 = vmatprep.subr.bf16.mxu1 %v3691_v33  ;;  %3518 = vmatprep.subr.bf16.mxu0 %v3691_v33 }
 0x1c6   : > { %v3500_v37 = vpack.c.bf16 %v2106_v29, %v2106_v29 }
 0x1c7   : > { %v1856_v32 = vcombine.high %v1700_v25, %v1700_v25  ;;  %v1863_v36 = vrot.slane %v1700_v25, %v4211_v14  ;;  %v1701_v3 = vmax.f32 %v1673_v26, 0.0  ;;  %2412 = vrot.lane.b32.xlu0 %v4295_v4, %s3741_s9 }
 0x1c8   : > { %2312 = vst.msk [vmem:[#allocation2 + $0x20] sm:$0xf] %vm2302_vm7, %v3500_v37  ;;  %3598 = vmatpush3.bf16.msra.mxu1 %v3692_v22  ;;  %3519 = vmatpush3.bf16.msra.mxu0 %v3692_v22 }
 0x1c9   : > { %v1870_v39 = vrot.slane %v1856_v32, %v4211_v14  ;;  %v1871_v40 = vcombine.high %v1863_v36, %v1863_v36  ;;  %v1873_v42 = vcombine.high %v1701_v3, %v1701_v3  ;;  %v1880_v43 = vrot.slane %v1701_v3, %v4211_v14  ;;  %3591 = vmatprep.subr.bf16.mxu1 %v3693_v53 }
 0x1ca   : > { %3520 = vmatprep.subr.bf16.mxu0 %v3693_v53 }
 0x1cb   : > { %v2107_v44 = vcombine.low %v1863_v36, %v1871_v40  ;;  %v1872_v38 = vcombine.high %v1870_v39, %v1870_v39  ;;  %v4313_v46 = vrot.slane %v1873_v42, %v4211_v14  ;;  %v1888_v49 = vcombine.high %v1880_v43, %v1880_v43  ;;  %v4322_v57 = vld [vmem:[#allocation2 + $0x18] sm:$0x7f]  }
 0x1cc   : > { %v2121_v54 = vrot.slane %v1870_v39, %v4211_v14  ;;  %2447 = vrot.lane.b32.xlu0 %v4322_v57, %s3742_s10  ;;  %2482 = vrot.lane.b32.xlu1 %v4322_v57, %s3745_s17  ;;  %v4334_v61 = vrot.slane %v4322_v57, 1  ;;  %v2390_v51 = vshll.u32 %v4322_v57, 16  ;;  %v2388_v59 = vshrl.u32 %v4322_v57, 16 }
 0x1cd   : > { %v2114_v52 = vrot.slane %v2107_v44, %v4211_v14  ;;  %v2123_v56 = vcombine.low %v1872_v38, %v1880_v43  ;;  %v2124_v23 = vcombine.low %v1888_v49, %v4313_v46  ;;  %v1889_v45 = vcombine.high %v4313_v46, %v4313_v46  ;;  %v3694_v38 = vld [vmem:[%s4695_s3 + $0x30] sm:$0xff]  }
 0x1ce   : > { %v4346_v7 = vrot.slane %v4334_v61, %v4211_v14  ;;  %v2392_v12 = vrot.slane %v2390_v51, 1  ;;  %3599 = vmatpush3.bf16.msra.mxu1 %v3694_v38  ;;  %3521 = vmatpush3.bf16.msra.mxu0 %v3694_v38 }
 0x1cf   : > { %v2122_v60 = vcombine.low %v2114_v52, %v2121_v54  ;;  %v2131_v27 = vrot.slane %v2123_v56, %v4211_v14  ;;  %v2138_v0 = vrot.slane %v2124_v23, %v4211_v14  ;;  %3592 = vmatprep.subr.bf16.mxu1 %v3695_v55  ;;  %3522 = vmatprep.subr.bf16.mxu0 %v3695_v55 }
 0x1d0   : > { %v1677_v1 = vpop.f32.mrb[20].mxu0  ;;  %2432 = vrot.lane.b32.xlu0 %v4334_v61, %s3745_s17  ;;  %2467 = vrot.lane.b32.xlu1 %v4334_v61, %s3741_s9  ;;  %v3454_v35 = vcombine.low %v2632_v47, %v4346_v7  ;;  %v4369_v21 = vor.u32 %v2392_v12, %v2388_v59 }
 0x1d1   : > { %v3501_v5 = vpack.c.bf16 %v2122_v60, %v2122_v60  ;;  %v2139_v18 = vcombine.low %v2131_v27, %v2138_v0  ;;  %v1678_v10 = vadd.f32 %v4207_v2, %v1677_v1  ;;  %v1679_v11 = vpop.f32.mrb[21].mxu0  ;;  %v3696_v27 = vld [vmem:[%s4695_s3 + $0x38] sm:$0xff]  }
 0x1d2   : > { %v1680_v13 = vpop.f32.mrb[22].mxu0  ;;  %v4375_v24 = vrot.slane %v3454_v35, %v4211_v14  ;;  %3600 = vmatpush3.bf16.msra.mxu1 %v3696_v27  ;;  %3523 = vmatpush3.bf16.msra.mxu0 %v3696_v27 }
 0x1d3   : > { %2313 = vst.msk [vmem:[#allocation2 + $0x24] sm:$0x7] %vm2304_vm8, %v3501_v5  ;;  %v3502_v15 = vpack.c.bf16 %v2139_v18, %v2139_v18  ;;  %v1702_v16 = vmax.f32 %v1678_v10, 0.0  ;;  %v1681_v17 = vadd.f32 %v4207_v2, %v1680_v13  ;;  %v1682_v19 = vpop.f32.mrb[23].mxu0 }
 0x1d4   : > { %2414 = vrot.lane.b32.xlu0 %v4369_v21, %s3741_s9  ;;  %2501 = vrot.lane.b32.xlu1 %v4369_v21, %s3742_s10  ;;  %v2883_v29 = vcombine.low %v4367_v20, %v4375_v24 }
 0x1d5   : > { %2314 = vst.msk [vmem:[#allocation2 + $0x28] sm:$0xf] %vm2302_vm7, %v3502_v15  ;;  %v1890_v25 = vcombine.high %v1702_v16, %v1702_v16  ;;  %v1897_v26 = vrot.slane %v1702_v16, %v4211_v14  ;;  %v1703_v28 = vmax.f32 %v1681_v17, 0.0 }
 0x1d7   : > { %v1904_v30 = vrot.slane %v1890_v25, %v4211_v14  ;;  %v1905_v63 = vcombine.high %v1897_v26, %v1897_v26  ;;  %v2140_v32 = vcombine.low %v1889_v45, %v1897_v26  ;;  %v1907_v36 = vcombine.high %v1703_v28, %v1703_v28 }
 0x1d8   : > { %v1914_v3 = vrot.slane %v1703_v28, %v4211_v14 }
 0x1d9   : > { %v1906_v37 = vcombine.high %v1904_v30, %v1904_v30  ;;  %v2147_v39 = vrot.slane %v2140_v32, %v4211_v14  ;;  %v2154_v40 = vrot.slane %v1905_v63, %v4211_v14  ;;  %v1921_v42 = vrot.slane %v1907_v36, %v4211_v14 }
 0x1da   : > { %v4392_v43 = vld [vmem:[#allocation2 + $0x20] sm:$0x7f]   ;;  %v1922_v44 = vcombine.high %v1914_v3, %v1914_v3 }
 0x1db   : > { %v2155_v46 = vcombine.low %v2147_v39, %v2154_v40  ;;  %v2156_v48 = vcombine.low %v1904_v30, %v1906_v37  ;;  %v1923_v49 = vcombine.high %v1921_v42, %v1921_v42  ;;  %2449 = vrot.lane.b32.xlu0 %v4392_v43, %s3742_s10  ;;  %2484 = vrot.lane.b32.xlu1 %v4392_v43, %s3745_s17  ;;  %v2397_v54 = vshll.u32 %v4392_v43, 16 }
 0x1dc   : > { %v2157_v52 = vcombine.low %v1914_v3, %v1922_v44  ;;  %v4410_v60 = vrot.slane %v4392_v43, 1  ;;  %v2395_v1 = vshrl.u32 %v4392_v43, 16 }
 0x1dd   : > { %v2164_v56 = vrot.slane %v2156_v48, %v4211_v14  ;;  %v3503_v23 = vpack.c.bf16 %v2155_v46, %v2155_v46  ;;  %v2399_v51 = vrot.slane %v2397_v54, 1  ;;  %v2173_v5 = vcombine.low %v1921_v42, %v1923_v49 }
 0x1de   : > { %v1685_v58 = vpop.f32.mrb[24].mxu0  ;;  %v2171_v62 = vrot.slane %v2157_v52, %v4211_v14  ;;  %v2672_v63 = vcombine.high %v4410_v60, %v4410_v60 }
 0x1df   : > { %v1686_v41 = vadd.f32 %v4207_v2, %v1685_v58  ;;  %v1687_v0 = vpop.f32.mrb[25].mxu0  ;;  %2315 = vst.msk [vmem:[#allocation2 + $0x2c] sm:$0x7] %vm2304_vm8, %v3503_v23  ;;  %2434 = vrot.lane.b32.xlu0 %v4410_v60, %s3745_s17  ;;  %2469 = vrot.lane.b32.xlu1 %v4410_v60, %s3741_s9  ;;  %v4424_v11 = vor.u32 %v2399_v51, %v2395_v1 }
 0x1e0   : > { %v1688_v47 = vpop.f32.mrb[26].mxu0  ;;  %v2172_v8 = vcombine.low %v2164_v56, %v2171_v62  ;;  %v2180_v33 = vrot.slane %v2173_v5, %v4211_v14  ;;  %v4459_v49 = vrot.slane %v2672_v63, %v4211_v14  ;;  %v4470_v62 = vld [vmem:[#allocation2] sm:$0x7f]   ;;  %v3749_v5 = vmov 0.0  }
 0x1e1   : > { %v1704_v9 = vmax.f32 %v1686_v41, 0.0  ;;  %v1689_v18 = vadd.f32 %v4207_v2, %v1688_v47  ;;  %v1690_v10 = vpop.f32.mrb[27].mxu0  ;;  %v2369_v51 = vshll.u32 %v4470_v62, 16  ;;  %3561 = vmatprep.subr.bf16.mxu1 %v3749_v5 }
 0x1e2   : > { %v3504_v12 = vpack.c.bf16 %v2172_v8, %v2172_v8 }
 0x1e3   : > { %v1924_v13 = vcombine.high %v1704_v9, %v1704_v9  ;;  %v1931_v59 = vrot.slane %v1704_v9, %v4211_v14  ;;  %v1705_v35 = vmax.f32 %v1689_v18, 0.0  ;;  %2416 = vrot.lane.b32.xlu0 %v4424_v11, %s3741_s9  ;;  %2503 = vrot.lane.b32.xlu1 %v4424_v11, %s3742_s10  ;;  %v2371_v18 = vrot.slane %v2369_v51, 1 }
 0x1e4   : > { %2316 = vst.msk [vmem:[#allocation2 + $0x30] sm:$0xf] %vm2302_vm7, %v3504_v12 }
 0x1e5   : > { %v1938_v2 = vrot.slane %v1924_v13, %v4211_v14  ;;  %v1939_v15 = vcombine.high %v1931_v59, %v1931_v59  ;;  %v2187_v16 = vrot.slane %v1931_v59, %v4211_v14  ;;  %v1941_v17 = vcombine.high %v1705_v35, %v1705_v35 }
 0x1e6   : > { %v1948_v19 = vrot.slane %v1705_v35, %v4211_v14  ;;  %v4437_v28 = vld [vmem:[#allocation2 + $0x28] sm:$0x7f]   ;;  %v2367_v13 = vshrl.u32 %v4470_v62, 16 }
 0x1e7   : > { %v2188_v22 = vcombine.low %v2180_v33, %v2187_v16  ;;  %v2189_v45 = vcombine.low %v1939_v15, %v1938_v2  ;;  %v1940_v25 = vcombine.high %v1938_v2, %v1938_v2  ;;  %v1955_v26 = vrot.slane %v1941_v17, %v4211_v14  ;;  %2451 = vrot.lane.b32.xlu0 %v4437_v28, %s3742_s10 }
 0x1e8   : > { %v1956_v30 = vcombine.high %v1948_v19, %v1948_v19  ;;  %2486 = vrot.lane.b32.xlu1 %v4437_v28, %s3745_s17  ;;  %v4446_v39 = vrot.slane %v4437_v28, 1  ;;  %v2404_v40 = vshll.u32 %v4437_v28, 16  ;;  %v2402_v55 = vshrl.u32 %v4437_v28, 16 }
 0x1e9   : > { %v3505_v32 = vpack.c.bf16 %v2188_v22, %v2188_v22  ;;  %v1957_v36 = vcombine.high %v1955_v26, %v1955_v26  ;;  %v2190_v3 = vcombine.low %v1940_v25, %v1948_v19  ;;  %v2197_v42 = vrot.slane %v2189_v45, %v4211_v14 }
 0x1ea   : > { %v2206_v37 = vcombine.low %v1956_v30, %v1955_v26  ;;  %v2406_v46 = vrot.slane %v2404_v40, 1  ;;  %v4456_v48 = vrot.slane %v4446_v39, %v4211_v14  ;;  %v2372_v35 = vor.u32 %v2371_v18, %v2367_v13 }
 0x1eb   : > { %2317 = vst.msk [vmem:[#allocation2 + $0x34] sm:$0x7] %vm2304_vm8, %v3505_v32  ;;  %v2204_v53 = vrot.slane %v2190_v3, %v4211_v14  ;;  %v2220_v44 = vrot.slane %v1957_v36, %v4211_v14  ;;  %2471 = vrot.lane.b32.xlu0 %v4446_v39, %s3741_s9  ;;  %v2420_v19 = vrot.slane %v4470_v62, 1 }
 0x1ec   : > { %v2213_v38 = vrot.slane %v2206_v37, %v4211_v14  ;;  %2436 = vrot.lane.b32.xlu1 %v4446_v39, %s3745_s17  ;;  %v3458_v56 = vcombine.low %v4459_v49, %v4456_v48  ;;  %v4468_v27 = vor.u32 %v2406_v46, %v2402_v55 }
 0x1ed   : > { %v2205_v52 = vcombine.low %v2197_v42, %v2204_v53 }
 0x1ee   : > { %v2221_v54 = vcombine.low %v2213_v38, %v2220_v44 }
 0x1ef   : > { %v3506_v23 = vpack.c.bf16 %v2205_v52, %v2205_v52 }
 0x1f0   : > { %v3507_v58 = vpack.c.bf16 %v2221_v54, %v2221_v54  ;;  %2505 = vrot.lane.b32.xlu1 %v4468_v27, %s3742_s10 }
 0x1f1   : > { %2318 = vst.msk [vmem:[#allocation2 + $0x38] sm:$0xf] %vm2302_vm7, %v3506_v23  ;;  %v2638_v23 = vcombine.high %v4334_v61, %v4334_v61 }
 0x1f2   : > { %2319 = vst.msk [vmem:[#allocation2 + $0x3c] sm:$0x7] %vm2304_vm8, %v3507_v58  ;;  %v3678_v41 = vld [vmem:[#allocation2 + $0x30] sm:$0x7f]  }
 0x1f3   : > { %2488 = vrot.lane.b32.xlu0 %v3678_v41, %s3745_s17  ;;  %v2458_v0 = vshll.u32 %v3678_v41, 16  ;;  %v2462_v47 = vrot.slane %v3678_v41, 1  ;;  %v2456_v1 = vshrl.u32 %v3678_v41, 16 }
 0x1f4   : > { %2418 = vrot.lane.b32.xlu1 %v4468_v27, %s3741_s9 }
 0x1f5   : > { %v2460_v8 = vrot.slane %v2458_v0, 1  ;;  %v2740_v10 = vcombine.high %v2462_v47, %v2462_v47  ;;  %v2761_v2 = vrot.slane %v2462_v47, %v4211_v14 }
 0x1f7   : > { %v4481_v9 = vor.u32 %v2460_v8, %v2456_v1  ;;  %v2768_v15 = vrot.slane %v2740_v10, %v4211_v14  ;;  %v4500_v45 = vrot.slane %v2761_v2, %v4211_v14  ;;  %v2693_v10 = vrot.slane %v4410_v60, %v4211_v14 }
 0x1f8   : > { %2453 = vrot.lane.b32.xlu1 %v3678_v41, %s3742_s10 }
 0x1f9   : > { %v3680_v12 = vld [vmem:[#allocation2 + $0x38] sm:$0x7f]   ;;  %2507 = vrot.lane.b32.xlu0 %v4481_v9, %s3742_s10 }
 0x1fa   : > { %v4487_v59 = vrot.slane %v3680_v12, 1  ;;  %v2495_v33 = vshll.u32 %v3680_v12, 16  ;;  %v2493_v26 = vshrl.u32 %v3680_v12, 16 }
 0x1fc   : > { %v4493_v16 = vrot.slane %v4487_v59, %v4211_v14  ;;  %2473 = vrot.lane.b32.xlu1 %v2462_v47, %s3741_s9  ;;  %v2497_v22 = vrot.slane %v2495_v33, 1 }
 0x1fd   : > { %2408 = vrot.lane.b32.xlu0 %v2372_v35, %s3741_s9 }
 0x1fe   : > { %v3462_v17 = vcombine.low %v2768_v15, %v4493_v16  ;;  %v2498_v63 = vor.u32 %v2497_v22, %v2493_v26  ;;  %v2915_v15 = vrot.slane %v2693_v10, %v4211_v14 }
 0x200   : > { %v4503_v25 = vrot.slane %v3462_v17, %v4211_v14  ;;  %2490 = vrot.lane.b32.xlu1 %v3680_v12, %s3745_s17 }
 0x201   : > { %2426 = vrot.lane.b32.xlu0 %v2420_v19, %s3745_s17 }
 0x202   : > { %v2988_v30 = vcombine.low %v4500_v45, %v4503_v25 }
 0x204   : > { %2509 = vrot.lane.b32.xlu1 %v2498_v63, %s3742_s10 }
 0x205   : > { %2443 = vrot.lane.b32.xlu0 %v4245_v31, %s3742_s10 }
 0x208   : > { %2463 = vrot.lane.b32.xlu1 %v2421_v34, %s3741_s9 }
 0x20c   : > { %2480 = vrot.lane.b32.xlu1 %v4268_v6, %s3745_s17 }
 0x210   : > { %2499 = vrot.lane.b32.xlu1 %v4295_v4, %s3742_s10 }
 0x226   : > { %v2429_v32 = vpop.permute.xlu0 %2428 }
 0x22a   : > { %v2411_v36 = vpop.permute.xlu0 %2410 }
 0x22b   : > { %v2515_v46 = vsel %vm532_vm1, %v4245_v31, %v2411_v36  ;;  %v2666_v31 = vrot.slane %v2638_v23, %v4211_v14  ;;  %v3698_v23 = vld [vmem:[%s4695_s3 + $0x88] sm:$0xff]  }
 0x22c   : > { %v2527_v54 = vsel %vm566_vm3, %v2515_v46, %v2429_v32 }
 0x231   : > { %v2446_v3 = vpop.permute.xlu0 %2445 }
 0x232   : > { %v2539_v41 = vsel %vm600_vm5, %v2527_v54, %v2446_v3 }
 0x233   : > { %v2466_v42 = vpop.permute.xlu1 %2465 }
 0x234   : > { %v2553_v34 = vsel %vm532_vm1, %v4295_v4, %v2466_v42 }
 0x235   : > { %v2431_v37 = vpop.permute.xlu0 %2430 }
 0x239   : > { %v2413_v40 = vpop.permute.xlu0 %2412 }
 0x23a   : > { %v2517_v33 = vsel %vm532_vm1, %v4268_v6, %v2413_v40 }
 0x23b   : > { %v2529_v22 = vsel %vm566_vm3, %v2517_v33, %v2431_v37 }
 0x23e   : > { %v2483_v53 = vpop.permute.xlu1 %2482  ;;  %v2448_v44 = vpop.permute.xlu0 %2447 }
 0x23f   : > { %v2569_v55 = vsel %vm566_vm3, %v2553_v34, %v2483_v53  ;;  %v2541_v6 = vsel %vm600_vm5, %v2529_v22, %v2448_v44  ;;  %v3697_v34 = vld [vmem:[%s4695_s3 + $0x80] sm:$0xff]  }
 0x242   : > { %v2468_v38 = vpop.permute.xlu1 %2467  ;;  %v2433_v52 = vpop.permute.xlu0 %2432 }
 0x243   : > { %v2556_v60 = vsel %vm532_vm1, %v4369_v21, %v2468_v38 }
 0x246   : > { %v2502_v58 = vpop.permute.xlu1 %2501  ;;  %v2415_v1 = vpop.permute.xlu0 %2414 }
 0x247   : > { %v2581_v0 = vsel %vm600_vm5, %v2569_v55, %v2502_v58  ;;  %v2519_v44 = vsel %vm532_vm1, %v4322_v57, %v2415_v1  ;;  %v2706_v57 = vcombine.high %v4446_v39, %v4446_v39 }
 0x248   : > { %v2637_v51 = vcombine.high %v2539_v41, %v2581_v0  ;;  %v2636_v47 = vcombine.low %v2539_v41, %v2581_v0  ;;  %v2531_v41 = vsel %vm566_vm3, %v2519_v44, %v2433_v52 }
 0x249   : > { %v2734_v10 = vrot.slane %v2706_v57, %v4211_v14 }
 0x24a   : > { %v2652_v8 = vrot.slane %v2637_v51, %v4211_v14  ;;  %v4534_v12 = vrot.slane %v2636_v47, %v4211_v14 }
 0x24c   : > { %v2669_v18 = vcombine.low %v2652_v8, %v2666_v31  ;;  %v2668_v17 = vcombine.high %v4534_v12, %v4346_v7 }
 0x24d   : > { %v2485_v4 = vpop.permute.xlu1 %2484  ;;  %v2450_v61 = vpop.permute.xlu0 %2449 }
 0x24e   : > { %v3456_v13 = vcombine.high %v4346_v7, %v2669_v18  ;;  %v2571_v26 = vsel %vm566_vm3, %v2556_v60, %v2485_v4  ;;  %v3455_v40 = vcombine.low %v2668_v17, %v2652_v8  ;;  %v2543_v1 = vsel %vm600_vm5, %v2531_v41, %v2450_v61 }
 0x250   : > { %v2901_v2 = vrot.slane %v3456_v13, %v4211_v14  ;;  %v2894_v21 = vrot.slane %v3455_v40, %v4211_v14 }
 0x251   : > { %v2470_v35 = vpop.permute.xlu1 %2469  ;;  %v4549_v63 = vpop.permute.xlu0 %2434 }
 0x252   : > { %v4545_v19 = vcombine.low %v2901_v2, %v2915_v15  ;;  %v2559_v58 = vsel %vm532_vm1, %v4424_v11, %v2470_v35 }
 0x255   : > { %v2504_v32 = vpop.permute.xlu1 %2503  ;;  %v2417_v42 = vpop.permute.xlu0 %2416 }
 0x256   : > { %v2583_v36 = vsel %vm600_vm5, %v2571_v26, %v2504_v32 }
 0x257   : > { %v2670_v3 = vcombine.low %v2541_v6, %v2583_v36  ;;  %v2671_v0 = vcombine.high %v2541_v6, %v2583_v36  ;;  %v2936_v6 = vrot.slane %v3458_v56, %v4211_v14 }
 0x259   : > { %v2679_v7 = vrot.slane %v2670_v3, %v4211_v14  ;;  %v2452_v55 = vpop.permute.xlu0 %2451  ;;  %v2686_v11 = vrot.slane %v2671_v0, %v4211_v14 }
 0x25a   : > { %v2487_v53 = vpop.permute.xlu1 %2486 }
 0x25b   : > { %v2908_v38 = vrot.slane %v2679_v7, %v4211_v14  ;;  %v2573_v51 = vsel %vm566_vm3, %v2559_v58, %v2487_v53 }
 0x25d   : > { %v2917_v37 = vcombine.high %v2894_v21, %v2908_v38  ;;  %v2916_v46 = vcombine.low %v2894_v21, %v2908_v38  ;;  %v2472_v18 = vpop.permute.xlu0 %2471  ;;  %v2521_v21 = vsel %vm532_vm1, %v4392_v43, %v2417_v42 }
 0x25e   : > { %v2437_v54 = vpop.permute.xlu1 %2436  ;;  %v2562_v38 = vsel %vm532_vm1, %v4468_v27, %v2472_v18  ;;  %v2533_v56 = vsel %vm566_vm3, %v2521_v21, %v4549_v63 }
 0x25f   : > { %3179 = vmatprep.mubr.bf16.mxu1 %v2917_v37  ;;  %v2545_v44 = vsel %vm600_vm5, %v2533_v56, %v2452_v55 }
 0x260   : > { %3180 = vmatmul.mubr.bf16.vlgmr.msra.gmra.mrb[0].mxu1 %v2916_v46 }
 0x261   : > { %3562 = vmatpush3.bf16.msra.mxu1 %v3697_v34 }
 0x262   : > { %3563 = vmatprep.subr.bf16.mxu1 %v3749_v5  ;;  %v2506_v47 = vpop.permute.xlu1 %2505 }
 0x263   : > { %v2585_v31 = vsel %vm600_vm5, %v2573_v51, %v2506_v47 }
 0x264   : > { %v2704_v8 = vcombine.low %v2543_v1, %v2585_v31  ;;  %v2705_v4 = vcombine.high %v2543_v1, %v2585_v31 }
 0x265   : > { %3564 = vmatpush3.bf16.msra.mxu1 %v3698_v23  ;;  %v2489_v17 = vpop.permute.xlu0 %2488 }
 0x266   : > { %v2713_v52 = vrot.slane %v2704_v8, %v4211_v14  ;;  %v2720_v13 = vrot.slane %v2705_v4, %v4211_v14  ;;  %v2419_v35 = vpop.permute.xlu1 %2418  ;;  %v2575_v37 = vsel %vm566_vm3, %v2562_v38, %v2489_v17 }
 0x268   : > { %v2736_v39 = vcombine.high %v2713_v52, %v4456_v48  ;;  %v2737_v33 = vcombine.low %v2720_v13, %v2734_v10  ;;  %v3457_v2 = vcombine.low %v2686_v11, %v2713_v52 }
 0x26a   : > { %v3459_v61 = vcombine.low %v2736_v39, %v2720_v13  ;;  %v3460_v15 = vcombine.high %v4456_v48, %v2737_v33  ;;  %v2454_v60 = vpop.permute.xlu1 %2453  ;;  %v2929_v22 = vrot.slane %v3457_v2, %v4211_v14  ;;  %v2523_v48 = vsel %vm532_vm1, %v4437_v28, %v2419_v35 }
 0x26b   : > { %v2508_v36 = vpop.permute.xlu0 %2507  ;;  %v2535_v27 = vsel %vm566_vm3, %v2523_v48, %v2437_v54 }
 0x26c   : > { %v2943_v26 = vrot.slane %v3459_v61, %v4211_v14  ;;  %v2950_v32 = vrot.slane %v3460_v15, %v4211_v14  ;;  %v2587_v49 = vsel %vm600_vm5, %v2575_v37, %v2508_v36  ;;  %v2547_v28 = vsel %vm600_vm5, %v2535_v27, %v2454_v60 }
 0x26d   : > { %v2738_v42 = vcombine.low %v2545_v44, %v2587_v49  ;;  %v2739_v23 = vcombine.high %v2545_v44, %v2587_v49 }
 0x26e   : > { %v2474_v3 = vpop.permute.xlu1 %2473  ;;  %v2952_v40 = vcombine.high %v2929_v22, %v2943_v26  ;;  %v2951_v7 = vcombine.low %v2929_v22, %v2943_v26  ;;  %v4586_v53 = vcombine.low %v2936_v6, %v2950_v32 }
 0x26f   : > { %v2409_v34 = vpop.permute.xlu0 %2408  ;;  %v2565_v43 = vsel %vm532_vm1, %v4481_v9, %v2474_v3  ;;  %v2747_v63 = vrot.slane %v2738_v42, %v4211_v14  ;;  %v2754_v55 = vrot.slane %v2739_v23, %v4211_v14 }
 0x270   : > { %3187 = vmatprep.mubr.bf16.mxu1 %v2952_v40  ;;  %v2513_v33 = vsel %vm532_vm1, %v4470_v62, %v2409_v34 }
 0x271   : > { %3188 = vmatmul.mubr.bf16.gmra.mrb[4].mxu1 %v2951_v7  ;;  %v2964_v18 = vrot.slane %v2747_v63, %v4211_v14 }
 0x272   : > { %v2491_v46 = vpop.permute.xlu1 %2490 }
 0x273   : > { %v2577_v58 = vsel %vm566_vm3, %v2565_v43, %v2491_v46  ;;  %v2427_v47 = vpop.permute.xlu0 %2426 }
 0x274   : > { %v2525_v61 = vsel %vm566_vm3, %v2513_v33, %v2427_v47  ;;  %v3452_v47 = vld [vmem:[%s4696_s4] ss:$0 sm:$0xff] }
 0x276   : > { %v2510_v41 = vpop.permute.xlu1 %2509 }
 0x277   : > { %v2589_v0 = vsel %vm600_vm5, %v2577_v58, %v2510_v41  ;;  %v2444_v52 = vpop.permute.xlu0 %2443 }
 0x278   : > { %v2772_v51 = vcombine.low %v2547_v28, %v2589_v0  ;;  %v2773_v57 = vcombine.high %v2547_v28, %v2589_v0  ;;  %v2537_v22 = vsel %vm600_vm5, %v2525_v61, %v2444_v52 }
 0x27a   : > { %v2781_v9 = vrot.slane %v2772_v51, %v4211_v14  ;;  %v2464_v1 = vpop.permute.xlu1 %2463  ;;  %v2788_v54 = vrot.slane %v2773_v57, %v4211_v14 }
 0x27b   : > { %v2550_v2 = vsel %vm532_vm1, %v4258_v50, %v2464_v1 }
 0x27c   : > { %v2804_v31 = vcombine.high %v2781_v9, %v4493_v16  ;;  %v3461_v8 = vcombine.low %v2754_v55, %v2781_v9 }
 0x27e   : > { %v3463_v4 = vcombine.low %v2804_v31, %v2788_v54  ;;  %v2481_v11 = vpop.permute.xlu1 %2480  ;;  %v2978_v10 = vrot.slane %v3461_v8, %v4211_v14 }
 0x27f   : > { %v2567_v15 = vsel %vm566_vm3, %v2550_v2, %v2481_v11 }
 0x280   : > { %v2987_v13 = vcombine.high %v2964_v18, %v2978_v10  ;;  %v2986_v35 = vcombine.low %v2964_v18, %v2978_v10  ;;  %v2997_v39 = vrot.slane %v3463_v4, %v4211_v14 }
 0x282   : > { %v2500_v17 = vpop.permute.xlu1 %2499  ;;  %3195 = vmatprep.mubr.bf16.mxu1 %v2987_v13  ;;  %v3005_v60 = vcombine.high %v2997_v39, %v2997_v39 }
 0x283   : > { %v2579_v26 = vsel %vm600_vm5, %v2567_v15, %v2500_v17  ;;  %3196 = vmatmul.mubr.bf16.gmra.mrb[8].mxu1 %v2986_v35 }
 0x284   : > { %v2602_v32 = vcombine.low %v2537_v22, %v2579_v26  ;;  %v2603_v6 = vcombine.high %v2537_v22, %v2579_v26  ;;  %3203 = vmatprep.mubr.bf16.mxu1 %v3005_v60 }
 0x286   : > { %v2611_v62 = vrot.slane %v2602_v32, %v4211_v14  ;;  %v2618_v36 = vrot.slane %v2603_v6, %v4211_v14 }
 0x288   : > { %v3453_v50 = vcombine.low %v2618_v36, %v4534_v12  ;;  %v2859_v3 = vrot.slane %v2611_v62, %v4211_v14  ;;  %v2774_v12 = vcombine.high %v4487_v59, %v4487_v59 }
 0x28a   : > { %v2873_v40 = vrot.slane %v3453_v50, %v4211_v14  ;;  %v2802_v38 = vrot.slane %v2774_v12, %v4211_v14 }
 0x28b   : > { %3204 = vmatmul.mubr.bf16.gmra.mrb[12].mxu1 %v2997_v39 }
 0x28c   : > { %v2881_v7 = vcombine.low %v2859_v3, %v2873_v40  ;;  %v2882_v21 = vcombine.high %v2859_v3, %v2873_v40  ;;  %3565 = vmatprep.mubr.msk.bf16.mxu1 %vm3750_vm9, %v3749_v5  ;;  %v2805_v20 = vcombine.low %v2788_v54, %v2802_v38 }
 0x28e   : > { %3171 = vmatprep.mubr.bf16.mxu0 %v2882_v21  ;;  %v3464_v24 = vcombine.high %v4493_v16, %v2805_v20 }
 0x28f   : > { %3172 = vmatmul.mubr.bf16.vlgmr.msra.gmra.mrb[28].mxu0 %v2881_v7 }
 0x293   : > { %3566 = vmatmul.mubr.msk.bf16.vlgmr.msra.gmra.mrb[16].mxu1 %vm532_vm1, %v2883_v29  ;;  %v3004_v29 = vrot.slane %v3464_v24, %v4211_v14 }
 0x294   : > { %3569 = vmatprep.mubr.msk.bf16.mxu1 %vm3750_vm9, %v3749_v5 }
 0x29b   : > { %3570 = vmatmul.mubr.msk.bf16.gmra.mrb[20].mxu1 %vm532_vm1, %v4545_v19 }
 0x29c   : > { %3573 = vmatprep.mubr.msk.bf16.mxu1 %vm3750_vm9, %v3749_v5 }
 0x2a3   : > { %3574 = vmatmul.mubr.msk.bf16.gmra.mrb[24].mxu1 %vm532_vm1, %v4586_v53 }
 0x2a4   : > { %3577 = vmatprep.mubr.msk.bf16.mxu1 %vm3750_vm9, %v3749_v5 }
 0x2ab   : > { %3578 = vmatmul.mubr.msk.bf16.gmra.mrb[28].mxu1 %vm532_vm1, %v2988_v30 }
 0x2ac   : > { %3581 = vmatprep.mubr.msk.bf16.mxu1 %vm3750_vm9, %v3749_v5 }
 0x2b3   : > { %3582 = vmatmul.mubr.msk.bf16.gmra.mrb[32].mxu1 %vm532_vm1, %v3004_v29 }
 0x333   : > { %v3530_v59 = vpop.f32.mrb[0].mxu1 }
 0x334   : > { %v3531_v19 = vpop.f32.mrb[1].mxu1 }
 0x335   : > { %v3532_v53 = vadd.f32 %v3531_v19, %v3530_v59  ;;  %v3533_v37 = vpop.f32.mrb[2].mxu1 }
 0x336   : > { %v3534_v46 = vpop.f32.mrb[3].mxu1 }
 0x337   : > { %v3535_v48 = vadd.f32 %v3534_v46, %v3533_v37  ;;  %v3182_v35 = vadd.f32 %v3532_v53, %v3452_v47 }
 0x339   : > { %v3185_v61 = vadd.f32 %v3535_v48, %v3452_v47 }
 0x344   : > { %v3536_v49 = vpop.f32.mrb[4].mxu1 }
 0x345   : > { %v3537_v45 = vpop.f32.mrb[5].mxu1 }
 0x346   : > { %v3538_v25 = vadd.f32 %v3537_v45, %v3536_v49  ;;  %v3539_v30 = vpop.f32.mrb[6].mxu1 }
 0x347   : > { %v3540_v56 = vpop.f32.mrb[7].mxu1 }
 0x348   : > { %v3541_v5 = vadd.f32 %v3540_v56, %v3539_v30  ;;  %v3190_v32 = vadd.f32 %v3538_v25, %v3452_v47 }
 0x34a   : > { %v3193_v50 = vadd.f32 %v3541_v5, %v3452_v47 }
 0x356   : > { %v3542_v34 = vpop.f32.mrb[8].mxu1 }
 0x357   : > { %v3543_v16 = vpop.f32.mrb[9].mxu1 }
 0x358   : > { %v3544_v14 = vadd.f32 %v3543_v16, %v3542_v34  ;;  %v3545_v44 = vpop.f32.mrb[10].mxu1 }
 0x359   : > { %v3546_v43 = vpop.f32.mrb[11].mxu1 }
 0x35a   : > { %v3547_v27 = vadd.f32 %v3546_v43, %v3545_v44  ;;  %v3198_v38 = vadd.f32 %v3544_v14, %v3452_v47 }
 0x35c   : > { %v3201_v59 = vadd.f32 %v3547_v27, %v3452_v47 }
 0x35e   : > { %v3548_v42 = vpop.f32.mrb[12].mxu1 }
 0x35f   : > { %v3549_v23 = vpop.f32.mrb[13].mxu1 }
 0x360   : > { %v3550_v58 = vadd.f32 %v3549_v23, %v3548_v42  ;;  %v3551_v41 = vpop.f32.mrb[14].mxu1 }
 0x361   : > { %v3552_v28 = vpop.f32.mrb[15].mxu1 }
 0x362   : > { %v3524_v0 = vpop.f32.mrb[28].mxu0  ;;  %v3206_v49 = vadd.f32 %v3550_v58, %v3452_v47 }
 0x363   : > { %v3525_v51 = vpop.f32.mrb[29].mxu0 }
 0x364   : > { %v3526_v57 = vadd.f32 %v3525_v51, %v3524_v0  ;;  %v3527_v63 = vpop.f32.mrb[30].mxu0 }
 0x365   : > { %v3528_v55 = vpop.f32.mrb[31].mxu0 }
 0x366   : > { %v3529_v9 = vadd.f32 %v3528_v55, %v3527_v63  ;;  %v3174_v1 = vadd.f32 %v3526_v57, %v3452_v47  ;;  %v3245_v54 = vpop.f32.mrb[16].mxu1 }
 0x367   : > { %v3567_v31 = vpop.f32.mrb[17].mxu1 }
 0x368   : > { %v3246_v8 = vadd.f32 %v3245_v54, %v3174_v1  ;;  %v3177_v4 = vadd.f32 %v3529_v9, %v3452_v47  ;;  %v3248_v11 = vpop.f32.mrb[18].mxu1 }
 0x369   : > { %v3568_v18 = vpop.f32.mrb[19].mxu1 }
 0x36a   : > { %v3283_v10 = vmax.f32 %v3246_v8, 0.0  ;;  %v3249_v52 = vadd.f32 %v3248_v11, %v3177_v4 }
 0x36c   : > { %3292 = vst.msk [vmem:[%s4657_s15] sm:$0xff] %vm532_vm1, %v3283_v10  ;;  %v3284_v13 = vmax.f32 %v3249_v52, 0.0 }
 0x36e   : > { %3293 = vst.msk [vmem:[%s4657_s15 + $0x8] sm:$0xff] %vm532_vm1, %v3284_v13  ;;  %v3253_v39 = vpop.f32.mrb[20].mxu1 }
 0x36f   : > { %v3254_v33 = vadd.f32 %v3253_v39, %v3182_v35  ;;  %v3571_v2 = vpop.f32.mrb[21].mxu1 }
 0x370   : > { %v3256_v15 = vpop.f32.mrb[22].mxu1 }
 0x371   : > { %v3285_v17 = vmax.f32 %v3254_v33, 0.0  ;;  %v3257_v60 = vadd.f32 %v3256_v15, %v3185_v61  ;;  %v3572_v22 = vpop.f32.mrb[23].mxu1 }
 0x373   : > { %3294 = vst.msk [vmem:[%s4657_s15 + $0x10] sm:$0xff] %vm532_vm1, %v3285_v17  ;;  %v3286_v26 = vmax.f32 %v3257_v60, 0.0 }
 0x375   : > { %3295 = vst.msk [vmem:[%s4657_s15 + $0x18] sm:$0xff] %vm532_vm1, %v3286_v26 }
 0x376   : > { %v3261_v6 = vpop.f32.mrb[24].mxu1 }
 0x377   : > { %v3262_v62 = vadd.f32 %v3261_v6, %v3190_v32  ;;  %v3575_v36 = vpop.f32.mrb[25].mxu1 }
 0x378   : > { %v3264_v3 = vpop.f32.mrb[26].mxu1 }
 0x379   : > { %v3287_v40 = vmax.f32 %v3262_v62, 0.0  ;;  %v3265_v7 = vadd.f32 %v3264_v3, %v3193_v50  ;;  %v3576_v21 = vpop.f32.mrb[27].mxu1 }
 0x37b   : > { %3296 = vst.msk [vmem:[%s4657_s15 + $0x20] sm:$0xff] %vm532_vm1, %v3287_v40  ;;  %v3288_v12 = vmax.f32 %v3265_v7, 0.0 }
 0x37d   : > { %3297 = vst.msk [vmem:[%s4657_s15 + $0x28] sm:$0xff] %vm532_vm1, %v3288_v12 }
 0x37e   : > { %v3269_v20 = vpop.f32.mrb[28].mxu1 }
 0x37f   : > { %v3270_v24 = vadd.f32 %v3269_v20, %v3198_v38  ;;  %v3579_v29 = vpop.f32.mrb[29].mxu1 }
 0x380   : > { %v3272_v19 = vpop.f32.mrb[30].mxu1 }
 0x381   : > { %v3289_v53 = vmax.f32 %v3270_v24, 0.0  ;;  %v3273_v37 = vadd.f32 %v3272_v19, %v3201_v59  ;;  %v3580_v46 = vpop.f32.mrb[31].mxu1 }
 0x383   : > { %3298 = vst.msk [vmem:[%s4657_s15 + $0x30] sm:$0xff] %vm532_vm1, %v3289_v53  ;;  %v3290_v48 = vmax.f32 %v3273_v37, 0.0 }
 0x385   : > { %3299 = vst.msk [vmem:[%s4657_s15 + $0x38] sm:$0xff] %vm532_vm1, %v3290_v48 }
 0x386   : > { %v3277_v45 = vpop.f32.mrb[32].mxu1 }
 0x387   : > { %v3278_v25 = vadd.f32 %v3277_v45, %v3206_v49  ;;  %v3583_v30 = vpop.f32.mrb[33].mxu1 }
 0x388   : > { %v3280_v56 = vpop.f32.mrb[34].mxu1 }
 0x389   : > { %v3291_v5 = vmax.f32 %v3278_v25, 0.0  ;;  %v3584_v34 = vpop.f32.mrb[35].mxu1 }
 0x38b   : > { %3300 = vst.msk [vmem:[%s4657_s15 + $0x40] sm:$0xff] %vm532_vm1, %v3291_v5 }
 0x38c PF: > { %s15_s22 = sadd.s32 1, %s3737_s22   ;;  %s4698_s18 = smov %s3729_s20 }
 0x38d   : > { %p12_p7 = scmp.ge.s32.totalorder %s15_s22, 6   ;;  %s4699_s19 = smov %s3733_s21 }
 0x38e   : > { %s4700_s20 = smov %s4703_s23  ;;  %s4701_s21 = smov %s4707_s24 }
 0x38f   :  { %14 = sbr.rel (!%p12_p7) target bundleno = 3 (0x3), region = 71 }

</bundles_post_ra>
